<compile_context>
chip_gen: v6e
topology: v6e:2x2x1
jax: 0.10.0
libtpu: 0.0.40
codegen_flags: <defaults>
</compile_context>

<pallas_src>
import jax
import jax.numpy as jnp
from jax.experimental import pallas as pl
from jax.experimental.pallas import tpu as pltpu


def _round_up(a, b):
    return (a + b - 1) // b * b


def _cdiv(a, b):
    return (a + b - 1) // b


def _attention_kernel(g_ref, x_ref, wg_ref, wx_ref, bsum_ref, wp_ref, bp_ref,
                      out_ref):
    # g_ref:   (F_g, TS, TLANE) VMEM  (pixels sublane/lane-dense)
    # x_ref:   (F_l, TS, TLANE) VMEM
    # wg_ref:  (F_int, F_g) SMEM f32  (folded conv+BN weights, W_g branch)
    # wx_ref:  (F_int, F_l) SMEM f32  (folded conv+BN weights, W_x branch)
    # bsum_ref:(F_int,)      SMEM f32 (folded bias of W_g branch + W_x branch)
    # wp_ref:  (F_int,)      SMEM f32 (folded psi conv+BN weights)
    # bp_ref:  (1,)          SMEM f32 (folded psi bias)
    # out_ref: (F_l, TS, TLANE) VMEM  (x * sigmoid(psi))
    f_int, f_g = wg_ref.shape
    f_l = wx_ref.shape[1]
    ts, tlane = out_ref.shape[1], out_ref.shape[2]

    # psi pre-activation accumulated as a full (TS, TLANE) slab.
    p = jnp.full((ts, tlane), bp_ref[0], dtype=jnp.float32)
    for o in range(f_int):
        # r = bg[o] + bx[o] + sum_c Wg[o,c]*g[c] + sum_c Wx[o,c]*x[c]
        r = jnp.full((ts, tlane), bsum_ref[o], dtype=jnp.float32)
        for c in range(f_g):
            r = r + wg_ref[o, c] * g_ref[c].astype(jnp.float32)
        for c in range(f_l):
            r = r + wx_ref[o, c] * x_ref[c].astype(jnp.float32)
        # ReLU, then the psi 1x1 conv (single output channel) folded in.
        p = p + wp_ref[o] * jnp.maximum(r, 0.0)

    psi = jax.nn.sigmoid(p)                            # (TS, TLANE)
    for c in range(f_l):
        out_ref[c] = (x_ref[c].astype(jnp.float32) * psi).astype(out_ref.dtype)


def _fold_bn(w, b, gamma, beta, mean, var, eps=1e-5):
    """Fold eval-mode BatchNorm into the preceding 1x1 conv weight/bias."""
    s = gamma / jnp.sqrt(var + eps)            # (C_out,)
    w_eff = w * s[:, None]                     # (C_out, C_in)
    b_eff = s * (b - mean) + beta              # (C_out,)
    return w_eff, b_eff


def attention_block(g, x, params, *, pixels_per_step=65536):
    """g, x: NCHW float32 arrays. Returns x * psi, NCHW."""
    N, F_g, H, W = g.shape
    _, F_l, _, _ = x.shape
    HW = H * W

    wg, bg = _fold_bn(params["wg"], params["bg"], params["g_gamma"],
                      params["g_beta"], params["g_mean"], params["g_var"])
    wx, bx = _fold_bn(params["wx"], params["bx"], params["x_gamma"],
                      params["x_beta"], params["x_mean"], params["x_var"])
    wp, bp = _fold_bn(params["wp"], params["bp"], params["p_gamma"],
                      params["p_beta"], params["p_mean"], params["p_var"])
    F_int = wg.shape[0]

    wgf = wg.astype(jnp.float32)                    # (F_int, F_g)
    wxf = wx.astype(jnp.float32)                    # (F_int, F_l)
    bsum = (bg + bx).astype(jnp.float32)            # (F_int,) combined branch bias
    wpv = wp.reshape(F_int).astype(jnp.float32)     # (F_int,)
    bpv = bp.reshape(1).astype(jnp.float32)         # (1,)

    # ---- tile geometry: sublane/lane-dense pixel blocks -------------------
    TLANE = 512 if HW >= 8 * 512 else 128           # lanes (multiple of 128)
    ts_needed = _round_up(_cdiv(HW, TLANE), 8)      # sublanes needed for HW
    ts_max = max(8, _round_up(pixels_per_step // TLANE, 8))
    TS = min(ts_needed, ts_max)
    # Keep at least ~4 grid steps when possible (feeds both v7x TensorCores
    # and keeps the input/output DMA pipeline overlapped).
    while N * _cdiv(HW, TS * TLANE) < 4 and TS > 8:
        TS = max(8, _round_up(TS // 2, 8))
    tile = TS * TLANE
    HW_pad = _round_up(HW, tile)
    T = HW_pad // tile

    # NCHW -> (N, C, H*W): a free view, no transpose / extra HBM pass.
    g3 = g.reshape(N, F_g, HW)
    x3 = x.reshape(N, F_l, HW)
    if HW_pad != HW:
        # Fallback for ragged spatial sizes (typical U-Net maps are divisible).
        pad = ((0, 0), (0, 0), (0, HW_pad - HW))
        g3 = jnp.pad(g3, pad)
        x3 = jnp.pad(x3, pad)
    # Sublane-dense 5-D view (free reshape of the last axis).
    g5 = g3.reshape(N, F_g, T, TS, TLANE)
    x5 = x3.reshape(N, F_l, T, TS, TLANE)

    grid = (N, T)
    # Weights/biases stay resident in SMEM (not pipelined per step).
    smem_spec = pl.BlockSpec(memory_space=pltpu.MemorySpace.SMEM)

    # VMEM budget: 3 slabs (g, x, out) x 2 buffers + in-kernel intermediates.
    vmem_est = 2 * (F_g + 2 * F_l) * tile * 4 + 8 * tile * 4
    cp_kwargs = dict(dimension_semantics=("parallel", "parallel"))
    if vmem_est > 14 * 1024 * 1024:
        cp_kwargs["vmem_limit_bytes"] = min(vmem_est + (4 << 20), 60 << 20)

    out5 = pl.pallas_call(
        _attention_kernel,
        out_shape=jax.ShapeDtypeStruct((N, F_l, T, TS, TLANE), x.dtype),
        grid_spec=pltpu.PrefetchScalarGridSpec(
            num_scalar_prefetch=0,
            grid=grid,
            in_specs=[
                pl.BlockSpec((None, F_g, None, TS, TLANE),
                             lambda n, t: (n, 0, t, 0, 0)),   # g slab
                pl.BlockSpec((None, F_l, None, TS, TLANE),
                             lambda n, t: (n, 0, t, 0, 0)),   # x slab
                smem_spec,   # Wg (folded)
                smem_spec,   # Wx (folded)
                smem_spec,   # bg + bx (folded)
                smem_spec,   # Wpsi (folded)
                smem_spec,   # bpsi (folded)
            ],
            out_specs=pl.BlockSpec((None, F_l, None, TS, TLANE),
                                   lambda n, t: (n, 0, t, 0, 0)),
        ),
        compiler_params=pltpu.CompilerParams(**cp_kwargs),
    )(g5, x5, wgf, wxf, bsum, wpv, bpv)

    out_flat = out5.reshape(N, F_l, HW_pad)
    if HW_pad != HW:
        out_flat = out_flat[:, :, :HW]
    return out_flat.reshape(N, F_l, H, W)


def _reference(g, x, params):
    """Plain-JAX reference mirroring the PyTorch module (eval-mode BN)."""
    def conv_bn(inp, w, b, gamma, beta, mean, var, eps=1e-5):
        y = jnp.einsum("nchw,oc->nohw", inp, w) + b[None, :, None, None]
        s = gamma / jnp.sqrt(var + eps)
        return y * s[None, :, None, None] + (beta - mean * s)[None, :, None, None]

    g1 = conv_bn(g, params["wg"], params["bg"], params["g_gamma"],
                 params["g_beta"], params["g_mean"], params["g_var"])
    x1 = conv_bn(x, params["wx"], params["bx"], params["x_gamma"],
                 params["x_beta"], params["x_mean"], params["x_var"])
    psi = jnp.maximum(g1 + x1, 0.0)
    psi = conv_bn(psi, params["wp"], params["bp"], params["p_gamma"],
                  params["p_beta"], params["p_mean"], params["p_var"])
    psi = jax.nn.sigmoid(psi)
    return x * psi


def make_params(key, F_g, F_l, F_int):
    ks = jax.random.split(key, 6)
    return {
        # conv weights (C_out, C_in) for 1x1 convs; biases (C_out,)
        "wg": jax.random.normal(ks[0], (F_int, F_g), jnp.float32) * 0.2,
        "bg": jax.random.normal(ks[1], (F_int,), jnp.float32) * 0.1,
        "wx": jax.random.normal(ks[2], (F_int, F_l), jnp.float32) * 0.2,
        "bx": jax.random.normal(ks[3], (F_int,), jnp.float32) * 0.1,
        "wp": jax.random.normal(ks[4], (1, F_int), jnp.float32) * 0.2,
        "bp": jax.random.normal(ks[5], (1,), jnp.float32) * 0.1,
        # BatchNorm params (eval mode): gamma, beta, running mean/var
        "g_gamma": jnp.ones((F_int,), jnp.float32),
        "g_beta": jnp.zeros((F_int,), jnp.float32),
        "g_mean": jnp.zeros((F_int,), jnp.float32),
        "g_var": jnp.ones((F_int,), jnp.float32),
        "x_gamma": jnp.ones((F_int,), jnp.float32),
        "x_beta": jnp.zeros((F_int,), jnp.float32),
        "x_mean": jnp.zeros((F_int,), jnp.float32),
        "x_var": jnp.ones((F_int,), jnp.float32),
        "p_gamma": jnp.ones((1,), jnp.float32),
        "p_beta": jnp.zeros((1,), jnp.float32),
        "p_mean": jnp.zeros((1,), jnp.float32),
        "p_var": jnp.ones((1,), jnp.float32),
    }


if __name__ == "__main__":
    F_g, F_l, F_int = 4, 4, 8
    N, H, W = 2, 16, 16

    key = jax.random.PRNGKey(0)
    kg, kx, kp = jax.random.split(key, 3)
    g = jax.random.normal(kg, (N, F_g, H, W), jnp.float32)
    x = jax.random.normal(kx, (N, F_l, H, W), jnp.float32)
    params = make_params(kp, F_g, F_l, F_int)

    out = attention_block(g, x, params)
    out = jax.block_until_ready(out)
    ref = _reference(g, x, params)
    assert out.shape == (N, F_l, H, W)
    assert jnp.allclose(out, ref, atol=1e-5, rtol=1e-5), "mismatch vs reference"

    # Ragged spatial size (exercises the padded-pixel fallback path).
    H2, W2 = 10, 10
    g2 = jax.random.normal(kg, (1, F_g, H2, W2), jnp.float32)
    x2 = jax.random.normal(kx, (1, F_l, H2, W2), jnp.float32)
    out2 = jax.block_until_ready(attention_block(g2, x2, params))
    ref2 = _reference(g2, x2, params)
    assert out2.shape == (1, F_l, H2, W2)
    assert jnp.allclose(out2, ref2, atol=1e-5, rtol=1e-5), "mismatch (padded path)"

    print("KERNEL_OK")
</pallas_src>

<mosaic_0001>
module attributes {stable_mosaic.version = 11 : i64} {
  func.func @_attention_kernel(%arg0: i32, %arg1: i32, %arg2: memref<1x4x1x8x128xf32, #tpu.memory_space<vmem>>, %arg3: memref<1x4x1x8x128xf32, #tpu.memory_space<vmem>>, %arg4: memref<8x4xf32, #tpu.memory_space<smem>>, %arg5: memref<8x4xf32, #tpu.memory_space<smem>>, %arg6: memref<8xf32, #tpu.memory_space<smem>>, %arg7: memref<8xf32, #tpu.memory_space<smem>>, %arg8: memref<1xf32, #tpu.memory_space<smem>>, %arg9: memref<1x4x1x8x128xf32, #tpu.memory_space<vmem>>) attributes {dimension_semantics = [#tpu.dimension_semantics<parallel>, #tpu.dimension_semantics<parallel>], iteration_bounds = array<i64: 2, 1>, scalar_prefetch = 0 : i64, scratch_operands = 0 : i64, tpu.core_type = #tpu.core_type<tc>, window_params = [{transform_indices = @transform_0, window_bounds = array<i64: 1, 4, 1, 8, 128>}, {transform_indices = @transform_1, window_bounds = array<i64: 1, 4, 1, 8, 128>}, {transform_indices = @transform_2, window_bounds = array<i64: 8, 4>}, {transform_indices = @transform_3, window_bounds = array<i64: 8, 4>}, {transform_indices = @transform_4, window_bounds = array<i64: 8>}, {transform_indices = @transform_5, window_bounds = array<i64: 8>}, {transform_indices = @transform_6, window_bounds = array<i64: 1>}, {transform_indices = @transform_7, window_bounds = array<i64: 1, 4, 1, 8, 128>}]} {
    %c0 = arith.constant 0 : index
    %0 = memref.load %arg8[%c0] : memref<1xf32, #tpu.memory_space<smem>>
    %1 = vector.broadcast %0 : f32 to vector<8x128xf32>
    %c0_0 = arith.constant 0 : index
    %2 = memref.load %arg6[%c0_0] : memref<8xf32, #tpu.memory_space<smem>>
    %3 = vector.broadcast %2 : f32 to vector<8x128xf32>
    %c0_1 = arith.constant 0 : index
    %c0_2 = arith.constant 0 : index
    %4 = memref.load %arg4[%c0_1, %c0_2] : memref<8x4xf32, #tpu.memory_space<smem>>
    %c0_3 = arith.constant 0 : index
    %c0_4 = arith.constant 0 : index
    %c0_5 = arith.constant 0 : index
    %c0_6 = arith.constant 0 : index
    %c0_7 = arith.constant 0 : index
    %5 = vector.load %arg2[%c0_3, %c0_4, %c0_5, %c0_6, %c0_7] : memref<1x4x1x8x128xf32, #tpu.memory_space<vmem>>, vector<1x1x1x8x128xf32>
    %6 = vector.shape_cast %5 : vector<1x1x1x8x128xf32> to vector<8x128xf32>
    %7 = vector.broadcast %4 : f32 to vector<8x128xf32>
    %8 = arith.mulf %7, %6 : vector<8x128xf32>
    %9 = arith.addf %3, %8 : vector<8x128xf32>
    %c0_8 = arith.constant 0 : index
    %c1 = arith.constant 1 : index
    %10 = memref.load %arg4[%c0_8, %c1] : memref<8x4xf32, #tpu.memory_space<smem>>
    %c0_9 = arith.constant 0 : index
    %c1_10 = arith.constant 1 : index
    %c0_11 = arith.constant 0 : index
    %c0_12 = arith.constant 0 : index
    %c0_13 = arith.constant 0 : index
    %11 = vector.load %arg2[%c0_9, %c1_10, %c0_11, %c0_12, %c0_13] : memref<1x4x1x8x128xf32, #tpu.memory_space<vmem>>, vector<1x1x1x8x128xf32>
    %12 = vector.shape_cast %11 : vector<1x1x1x8x128xf32> to vector<8x128xf32>
    %13 = vector.broadcast %10 : f32 to vector<8x128xf32>
    %14 = arith.mulf %13, %12 : vector<8x128xf32>
    %15 = arith.addf %9, %14 : vector<8x128xf32>
    %c0_14 = arith.constant 0 : index
    %c2 = arith.constant 2 : index
    %16 = memref.load %arg4[%c0_14, %c2] : memref<8x4xf32, #tpu.memory_space<smem>>
    %c0_15 = arith.constant 0 : index
    %c2_16 = arith.constant 2 : index
    %c0_17 = arith.constant 0 : index
    %c0_18 = arith.constant 0 : index
    %c0_19 = arith.constant 0 : index
    %17 = vector.load %arg2[%c0_15, %c2_16, %c0_17, %c0_18, %c0_19] : memref<1x4x1x8x128xf32, #tpu.memory_space<vmem>>, vector<1x1x1x8x128xf32>
    %18 = vector.shape_cast %17 : vector<1x1x1x8x128xf32> to vector<8x128xf32>
    %19 = vector.broadcast %16 : f32 to vector<8x128xf32>
    %20 = arith.mulf %19, %18 : vector<8x128xf32>
    %21 = arith.addf %15, %20 : vector<8x128xf32>
    %c0_20 = arith.constant 0 : index
    %c3 = arith.constant 3 : index
    %22 = memref.load %arg4[%c0_20, %c3] : memref<8x4xf32, #tpu.memory_space<smem>>
    %c0_21 = arith.constant 0 : index
    %c3_22 = arith.constant 3 : index
    %c0_23 = arith.constant 0 : index
    %c0_24 = arith.constant 0 : index
    %c0_25 = arith.constant 0 : index
    %23 = vector.load %arg2[%c0_21, %c3_22, %c0_23, %c0_24, %c0_25] : memref<1x4x1x8x128xf32, #tpu.memory_space<vmem>>, vector<1x1x1x8x128xf32>
    %24 = vector.shape_cast %23 : vector<1x1x1x8x128xf32> to vector<8x128xf32>
    %25 = vector.broadcast %22 : f32 to vector<8x128xf32>
    %26 = arith.mulf %25, %24 : vector<8x128xf32>
    %27 = arith.addf %21, %26 : vector<8x128xf32>
    %c0_26 = arith.constant 0 : index
    %c0_27 = arith.constant 0 : index
    %28 = memref.load %arg5[%c0_26, %c0_27] : memref<8x4xf32, #tpu.memory_space<smem>>
    %c0_28 = arith.constant 0 : index
    %c0_29 = arith.constant 0 : index
    %c0_30 = arith.constant 0 : index
    %c0_31 = arith.constant 0 : index
    %c0_32 = arith.constant 0 : index
    %29 = vector.load %arg3[%c0_28, %c0_29, %c0_30, %c0_31, %c0_32] : memref<1x4x1x8x128xf32, #tpu.memory_space<vmem>>, vector<1x1x1x8x128xf32>
    %30 = vector.shape_cast %29 : vector<1x1x1x8x128xf32> to vector<8x128xf32>
    %31 = vector.broadcast %28 : f32 to vector<8x128xf32>
    %32 = arith.mulf %31, %30 : vector<8x128xf32>
    %33 = arith.addf %27, %32 : vector<8x128xf32>
    %c0_33 = arith.constant 0 : index
    %c1_34 = arith.constant 1 : index
    %34 = memref.load %arg5[%c0_33, %c1_34] : memref<8x4xf32, #tpu.memory_space<smem>>
    %c0_35 = arith.constant 0 : index
    %c1_36 = arith.constant 1 : index
    %c0_37 = arith.constant 0 : index
    %c0_38 = arith.constant 0 : index
    %c0_39 = arith.constant 0 : index
    %35 = vector.load %arg3[%c0_35, %c1_36, %c0_37, %c0_38, %c0_39] : memref<1x4x1x8x128xf32, #tpu.memory_space<vmem>>, vector<1x1x1x8x128xf32>
    %36 = vector.shape_cast %35 : vector<1x1x1x8x128xf32> to vector<8x128xf32>
    %37 = vector.broadcast %34 : f32 to vector<8x128xf32>
    %38 = arith.mulf %37, %36 : vector<8x128xf32>
    %39 = arith.addf %33, %38 : vector<8x128xf32>
    %c0_40 = arith.constant 0 : index
    %c2_41 = arith.constant 2 : index
    %40 = memref.load %arg5[%c0_40, %c2_41] : memref<8x4xf32, #tpu.memory_space<smem>>
    %c0_42 = arith.constant 0 : index
    %c2_43 = arith.constant 2 : index
    %c0_44 = arith.constant 0 : index
    %c0_45 = arith.constant 0 : index
    %c0_46 = arith.constant 0 : index
    %41 = vector.load %arg3[%c0_42, %c2_43, %c0_44, %c0_45, %c0_46] : memref<1x4x1x8x128xf32, #tpu.memory_space<vmem>>, vector<1x1x1x8x128xf32>
    %42 = vector.shape_cast %41 : vector<1x1x1x8x128xf32> to vector<8x128xf32>
    %43 = vector.broadcast %40 : f32 to vector<8x128xf32>
    %44 = arith.mulf %43, %42 : vector<8x128xf32>
    %45 = arith.addf %39, %44 : vector<8x128xf32>
    %c0_47 = arith.constant 0 : index
    %c3_48 = arith.constant 3 : index
    %46 = memref.load %arg5[%c0_47, %c3_48] : memref<8x4xf32, #tpu.memory_space<smem>>
    %c0_49 = arith.constant 0 : index
    %c3_50 = arith.constant 3 : index
    %c0_51 = arith.constant 0 : index
    %c0_52 = arith.constant 0 : index
    %c0_53 = arith.constant 0 : index
    %47 = vector.load %arg3[%c0_49, %c3_50, %c0_51, %c0_52, %c0_53] : memref<1x4x1x8x128xf32, #tpu.memory_space<vmem>>, vector<1x1x1x8x128xf32>
    %48 = vector.shape_cast %47 : vector<1x1x1x8x128xf32> to vector<8x128xf32>
    %49 = vector.broadcast %46 : f32 to vector<8x128xf32>
    %50 = arith.mulf %49, %48 : vector<8x128xf32>
    %51 = arith.addf %45, %50 : vector<8x128xf32>
    %c0_54 = arith.constant 0 : index
    %52 = memref.load %arg7[%c0_54] : memref<8xf32, #tpu.memory_space<smem>>
    %cst = arith.constant 0.000000e+00 : f32
    %53 = vector.broadcast %cst : f32 to vector<8x128xf32>
    %54 = arith.maximumf %51, %53 : vector<8x128xf32>
    %55 = vector.broadcast %52 : f32 to vector<8x128xf32>
    %56 = arith.mulf %55, %54 : vector<8x128xf32>
    %57 = arith.addf %1, %56 : vector<8x128xf32>
    %c1_55 = arith.constant 1 : index
    %58 = memref.load %arg6[%c1_55] : memref<8xf32, #tpu.memory_space<smem>>
    %59 = vector.broadcast %58 : f32 to vector<8x128xf32>
    %c1_56 = arith.constant 1 : index
    %c0_57 = arith.constant 0 : index
    %60 = memref.load %arg4[%c1_56, %c0_57] : memref<8x4xf32, #tpu.memory_space<smem>>
    %c0_58 = arith.constant 0 : index
    %c0_59 = arith.constant 0 : index
    %c0_60 = arith.constant 0 : index
    %c0_61 = arith.constant 0 : index
    %c0_62 = arith.constant 0 : index
    %61 = vector.load %arg2[%c0_58, %c0_59, %c0_60, %c0_61, %c0_62] : memref<1x4x1x8x128xf32, #tpu.memory_space<vmem>>, vector<1x1x1x8x128xf32>
    %62 = vector.shape_cast %61 : vector<1x1x1x8x128xf32> to vector<8x128xf32>
    %63 = vector.broadcast %60 : f32 to vector<8x128xf32>
    %64 = arith.mulf %63, %62 : vector<8x128xf32>
    %65 = arith.addf %59, %64 : vector<8x128xf32>
    %c1_63 = arith.constant 1 : index
    %c1_64 = arith.constant 1 : index
    %66 = memref.load %arg4[%c1_63, %c1_64] : memref<8x4xf32, #tpu.memory_space<smem>>
    %c0_65 = arith.constant 0 : index
    %c1_66 = arith.constant 1 : index
    %c0_67 = arith.constant 0 : index
    %c0_68 = arith.constant 0 : index
    %c0_69 = arith.constant 0 : index
    %67 = vector.load %arg2[%c0_65, %c1_66, %c0_67, %c0_68, %c0_69] : memref<1x4x1x8x128xf32, #tpu.memory_space<vmem>>, vector<1x1x1x8x128xf32>
    %68 = vector.shape_cast %67 : vector<1x1x1x8x128xf32> to vector<8x128xf32>
    %69 = vector.broadcast %66 : f32 to vector<8x128xf32>
    %70 = arith.mulf %69, %68 : vector<8x128xf32>
    %71 = arith.addf %65, %70 : vector<8x128xf32>
    %c1_70 = arith.constant 1 : index
    %c2_71 = arith.constant 2 : index
    %72 = memref.load %arg4[%c1_70, %c2_71] : memref<8x4xf32, #tpu.memory_space<smem>>
    %c0_72 = arith.constant 0 : index
    %c2_73 = arith.constant 2 : index
    %c0_74 = arith.constant 0 : index
    %c0_75 = arith.constant 0 : index
    %c0_76 = arith.constant 0 : index
    %73 = vector.load %arg2[%c0_72, %c2_73, %c0_74, %c0_75, %c0_76] : memref<1x4x1x8x128xf32, #tpu.memory_space<vmem>>, vector<1x1x1x8x128xf32>
    %74 = vector.shape_cast %73 : vector<1x1x1x8x128xf32> to vector<8x128xf32>
    %75 = vector.broadcast %72 : f32 to vector<8x128xf32>
    %76 = arith.mulf %75, %74 : vector<8x128xf32>
    %77 = arith.addf %71, %76 : vector<8x128xf32>
    %c1_77 = arith.constant 1 : index
    %c3_78 = arith.constant 3 : index
    %78 = memref.load %arg4[%c1_77, %c3_78] : memref<8x4xf32, #tpu.memory_space<smem>>
    %c0_79 = arith.constant 0 : index
    %c3_80 = arith.constant 3 : index
    %c0_81 = arith.constant 0 : index
    %c0_82 = arith.constant 0 : index
    %c0_83 = arith.constant 0 : index
    %79 = vector.load %arg2[%c0_79, %c3_80, %c0_81, %c0_82, %c0_83] : memref<1x4x1x8x128xf32, #tpu.memory_space<vmem>>, vector<1x1x1x8x128xf32>
    %80 = vector.shape_cast %79 : vector<1x1x1x8x128xf32> to vector<8x128xf32>
    %81 = vector.broadcast %78 : f32 to vector<8x128xf32>
    %82 = arith.mulf %81, %80 : vector<8x128xf32>
    %83 = arith.addf %77, %82 : vector<8x128xf32>
    %c1_84 = arith.constant 1 : index
    %c0_85 = arith.constant 0 : index
    %84 = memref.load %arg5[%c1_84, %c0_85] : memref<8x4xf32, #tpu.memory_space<smem>>
    %c0_86 = arith.constant 0 : index
    %c0_87 = arith.constant 0 : index
    %c0_88 = arith.constant 0 : index
    %c0_89 = arith.constant 0 : index
    %c0_90 = arith.constant 0 : index
    %85 = vector.load %arg3[%c0_86, %c0_87, %c0_88, %c0_89, %c0_90] : memref<1x4x1x8x128xf32, #tpu.memory_space<vmem>>, vector<1x1x1x8x128xf32>
    %86 = vector.shape_cast %85 : vector<1x1x1x8x128xf32> to vector<8x128xf32>
    %87 = vector.broadcast %84 : f32 to vector<8x128xf32>
    %88 = arith.mulf %87, %86 : vector<8x128xf32>
    %89 = arith.addf %83, %88 : vector<8x128xf32>
    %c1_91 = arith.constant 1 : index
    %c1_92 = arith.constant 1 : index
    %90 = memref.load %arg5[%c1_91, %c1_92] : memref<8x4xf32, #tpu.memory_space<smem>>
    %c0_93 = arith.constant 0 : index
    %c1_94 = arith.constant 1 : index
    %c0_95 = arith.constant 0 : index
    %c0_96 = arith.constant 0 : index
    %c0_97 = arith.constant 0 : index
    %91 = vector.load %arg3[%c0_93, %c1_94, %c0_95, %c0_96, %c0_97] : memref<1x4x1x8x128xf32, #tpu.memory_space<vmem>>, vector<1x1x1x8x128xf32>
    %92 = vector.shape_cast %91 : vector<1x1x1x8x128xf32> to vector<8x128xf32>
    %93 = vector.broadcast %90 : f32 to vector<8x128xf32>
    %94 = arith.mulf %93, %92 : vector<8x128xf32>
    %95 = arith.addf %89, %94 : vector<8x128xf32>
    %c1_98 = arith.constant 1 : index
    %c2_99 = arith.constant 2 : index
    %96 = memref.load %arg5[%c1_98, %c2_99] : memref<8x4xf32, #tpu.memory_space<smem>>
    %c0_100 = arith.constant 0 : index
    %c2_101 = arith.constant 2 : index
    %c0_102 = arith.constant 0 : index
    %c0_103 = arith.constant 0 : index
    %c0_104 = arith.constant 0 : index
    %97 = vector.load %arg3[%c0_100, %c2_101, %c0_102, %c0_103, %c0_104] : memref<1x4x1x8x128xf32, #tpu.memory_space<vmem>>, vector<1x1x1x8x128xf32>
    %98 = vector.shape_cast %97 : vector<1x1x1x8x128xf32> to vector<8x128xf32>
    %99 = vector.broadcast %96 : f32 to vector<8x128xf32>
    %100 = arith.mulf %99, %98 : vector<8x128xf32>
    %101 = arith.addf %95, %100 : vector<8x128xf32>
    %c1_105 = arith.constant 1 : index
    %c3_106 = arith.constant 3 : index
    %102 = memref.load %arg5[%c1_105, %c3_106] : memref<8x4xf32, #tpu.memory_space<smem>>
    %c0_107 = arith.constant 0 : index
    %c3_108 = arith.constant 3 : index
    %c0_109 = arith.constant 0 : index
    %c0_110 = arith.constant 0 : index
    %c0_111 = arith.constant 0 : index
    %103 = vector.load %arg3[%c0_107, %c3_108, %c0_109, %c0_110, %c0_111] : memref<1x4x1x8x128xf32, #tpu.memory_space<vmem>>, vector<1x1x1x8x128xf32>
    %104 = vector.shape_cast %103 : vector<1x1x1x8x128xf32> to vector<8x128xf32>
    %105 = vector.broadcast %102 : f32 to vector<8x128xf32>
    %106 = arith.mulf %105, %104 : vector<8x128xf32>
    %107 = arith.addf %101, %106 : vector<8x128xf32>
    %c1_112 = arith.constant 1 : index
    %108 = memref.load %arg7[%c1_112] : memref<8xf32, #tpu.memory_space<smem>>
    %cst_113 = arith.constant 0.000000e+00 : f32
    %109 = vector.broadcast %cst_113 : f32 to vector<8x128xf32>
    %110 = arith.maximumf %107, %109 : vector<8x128xf32>
    %111 = vector.broadcast %108 : f32 to vector<8x128xf32>
    %112 = arith.mulf %111, %110 : vector<8x128xf32>
    %113 = arith.addf %57, %112 : vector<8x128xf32>
    %c2_114 = arith.constant 2 : index
    %114 = memref.load %arg6[%c2_114] : memref<8xf32, #tpu.memory_space<smem>>
    %115 = vector.broadcast %114 : f32 to vector<8x128xf32>
    %c2_115 = arith.constant 2 : index
    %c0_116 = arith.constant 0 : index
    %116 = memref.load %arg4[%c2_115, %c0_116] : memref<8x4xf32, #tpu.memory_space<smem>>
    %c0_117 = arith.constant 0 : index
    %c0_118 = arith.constant 0 : index
    %c0_119 = arith.constant 0 : index
    %c0_120 = arith.constant 0 : index
    %c0_121 = arith.constant 0 : index
    %117 = vector.load %arg2[%c0_117, %c0_118, %c0_119, %c0_120, %c0_121] : memref<1x4x1x8x128xf32, #tpu.memory_space<vmem>>, vector<1x1x1x8x128xf32>
    %118 = vector.shape_cast %117 : vector<1x1x1x8x128xf32> to vector<8x128xf32>
    %119 = vector.broadcast %116 : f32 to vector<8x128xf32>
    %120 = arith.mulf %119, %118 : vector<8x128xf32>
    %121 = arith.addf %115, %120 : vector<8x128xf32>
    %c2_122 = arith.constant 2 : index
    %c1_123 = arith.constant 1 : index
    %122 = memref.load %arg4[%c2_122, %c1_123] : memref<8x4xf32, #tpu.memory_space<smem>>
    %c0_124 = arith.constant 0 : index
    %c1_125 = arith.constant 1 : index
    %c0_126 = arith.constant 0 : index
    %c0_127 = arith.constant 0 : index
    %c0_128 = arith.constant 0 : index
    %123 = vector.load %arg2[%c0_124, %c1_125, %c0_126, %c0_127, %c0_128] : memref<1x4x1x8x128xf32, #tpu.memory_space<vmem>>, vector<1x1x1x8x128xf32>
    %124 = vector.shape_cast %123 : vector<1x1x1x8x128xf32> to vector<8x128xf32>
    %125 = vector.broadcast %122 : f32 to vector<8x128xf32>
    %126 = arith.mulf %125, %124 : vector<8x128xf32>
    %127 = arith.addf %121, %126 : vector<8x128xf32>
    %c2_129 = arith.constant 2 : index
    %c2_130 = arith.constant 2 : index
    %128 = memref.load %arg4[%c2_129, %c2_130] : memref<8x4xf32, #tpu.memory_space<smem>>
    %c0_131 = arith.constant 0 : index
    %c2_132 = arith.constant 2 : index
    %c0_133 = arith.constant 0 : index
    %c0_134 = arith.constant 0 : index
    %c0_135 = arith.constant 0 : index
    %129 = vector.load %arg2[%c0_131, %c2_132, %c0_133, %c0_134, %c0_135] : memref<1x4x1x8x128xf32, #tpu.memory_space<vmem>>, vector<1x1x1x8x128xf32>
    %130 = vector.shape_cast %129 : vector<1x1x1x8x128xf32> to vector<8x128xf32>
    %131 = vector.broadcast %128 : f32 to vector<8x128xf32>
    %132 = arith.mulf %131, %130 : vector<8x128xf32>
    %133 = arith.addf %127, %132 : vector<8x128xf32>
    %c2_136 = arith.constant 2 : index
    %c3_137 = arith.constant 3 : index
    %134 = memref.load %arg4[%c2_136, %c3_137] : memref<8x4xf32, #tpu.memory_space<smem>>
    %c0_138 = arith.constant 0 : index
    %c3_139 = arith.constant 3 : index
    %c0_140 = arith.constant 0 : index
    %c0_141 = arith.constant 0 : index
    %c0_142 = arith.constant 0 : index
    %135 = vector.load %arg2[%c0_138, %c3_139, %c0_140, %c0_141, %c0_142] : memref<1x4x1x8x128xf32, #tpu.memory_space<vmem>>, vector<1x1x1x8x128xf32>
    %136 = vector.shape_cast %135 : vector<1x1x1x8x128xf32> to vector<8x128xf32>
    %137 = vector.broadcast %134 : f32 to vector<8x128xf32>
    %138 = arith.mulf %137, %136 : vector<8x128xf32>
    %139 = arith.addf %133, %138 : vector<8x128xf32>
    %c2_143 = arith.constant 2 : index
    %c0_144 = arith.constant 0 : index
    %140 = memref.load %arg5[%c2_143, %c0_144] : memref<8x4xf32, #tpu.memory_space<smem>>
    %c0_145 = arith.constant 0 : index
    %c0_146 = arith.constant 0 : index
    %c0_147 = arith.constant 0 : index
    %c0_148 = arith.constant 0 : index
    %c0_149 = arith.constant 0 : index
    %141 = vector.load %arg3[%c0_145, %c0_146, %c0_147, %c0_148, %c0_149] : memref<1x4x1x8x128xf32, #tpu.memory_space<vmem>>, vector<1x1x1x8x128xf32>
    %142 = vector.shape_cast %141 : vector<1x1x1x8x128xf32> to vector<8x128xf32>
    %143 = vector.broadcast %140 : f32 to vector<8x128xf32>
    %144 = arith.mulf %143, %142 : vector<8x128xf32>
    %145 = arith.addf %139, %144 : vector<8x128xf32>
    %c2_150 = arith.constant 2 : index
    %c1_151 = arith.constant 1 : index
    %146 = memref.load %arg5[%c2_150, %c1_151] : memref<8x4xf32, #tpu.memory_space<smem>>
    %c0_152 = arith.constant 0 : index
    %c1_153 = arith.constant 1 : index
    %c0_154 = arith.constant 0 : index
    %c0_155 = arith.constant 0 : index
    %c0_156 = arith.constant 0 : index
    %147 = vector.load %arg3[%c0_152, %c1_153, %c0_154, %c0_155, %c0_156] : memref<1x4x1x8x128xf32, #tpu.memory_space<vmem>>, vector<1x1x1x8x128xf32>
    %148 = vector.shape_cast %147 : vector<1x1x1x8x128xf32> to vector<8x128xf32>
    %149 = vector.broadcast %146 : f32 to vector<8x128xf32>
    %150 = arith.mulf %149, %148 : vector<8x128xf32>
    %151 = arith.addf %145, %150 : vector<8x128xf32>
    %c2_157 = arith.constant 2 : index
    %c2_158 = arith.constant 2 : index
    %152 = memref.load %arg5[%c2_157, %c2_158] : memref<8x4xf32, #tpu.memory_space<smem>>
    %c0_159 = arith.constant 0 : index
    %c2_160 = arith.constant 2 : index
    %c0_161 = arith.constant 0 : index
    %c0_162 = arith.constant 0 : index
    %c0_163 = arith.constant 0 : index
    %153 = vector.load %arg3[%c0_159, %c2_160, %c0_161, %c0_162, %c0_163] : memref<1x4x1x8x128xf32, #tpu.memory_space<vmem>>, vector<1x1x1x8x128xf32>
    %154 = vector.shape_cast %153 : vector<1x1x1x8x128xf32> to vector<8x128xf32>
    %155 = vector.broadcast %152 : f32 to vector<8x128xf32>
    %156 = arith.mulf %155, %154 : vector<8x128xf32>
    %157 = arith.addf %151, %156 : vector<8x128xf32>
    %c2_164 = arith.constant 2 : index
    %c3_165 = arith.constant 3 : index
    %158 = memref.load %arg5[%c2_164, %c3_165] : memref<8x4xf32, #tpu.memory_space<smem>>
    %c0_166 = arith.constant 0 : index
    %c3_167 = arith.constant 3 : index
    %c0_168 = arith.constant 0 : index
    %c0_169 = arith.constant 0 : index
    %c0_170 = arith.constant 0 : index
    %159 = vector.load %arg3[%c0_166, %c3_167, %c0_168, %c0_169, %c0_170] : memref<1x4x1x8x128xf32, #tpu.memory_space<vmem>>, vector<1x1x1x8x128xf32>
    %160 = vector.shape_cast %159 : vector<1x1x1x8x128xf32> to vector<8x128xf32>
    %161 = vector.broadcast %158 : f32 to vector<8x128xf32>
    %162 = arith.mulf %161, %160 : vector<8x128xf32>
    %163 = arith.addf %157, %162 : vector<8x128xf32>
    %c2_171 = arith.constant 2 : index
    %164 = memref.load %arg7[%c2_171] : memref<8xf32, #tpu.memory_space<smem>>
    %cst_172 = arith.constant 0.000000e+00 : f32
    %165 = vector.broadcast %cst_172 : f32 to vector<8x128xf32>
    %166 = arith.maximumf %163, %165 : vector<8x128xf32>
    %167 = vector.broadcast %164 : f32 to vector<8x128xf32>
    %168 = arith.mulf %167, %166 : vector<8x128xf32>
    %169 = arith.addf %113, %168 : vector<8x128xf32>
    %c3_173 = arith.constant 3 : index
    %170 = memref.load %arg6[%c3_173] : memref<8xf32, #tpu.memory_space<smem>>
    %171 = vector.broadcast %170 : f32 to vector<8x128xf32>
    %c3_174 = arith.constant 3 : index
    %c0_175 = arith.constant 0 : index
    %172 = memref.load %arg4[%c3_174, %c0_175] : memref<8x4xf32, #tpu.memory_space<smem>>
    %c0_176 = arith.constant 0 : index
    %c0_177 = arith.constant 0 : index
    %c0_178 = arith.constant 0 : index
    %c0_179 = arith.constant 0 : index
    %c0_180 = arith.constant 0 : index
    %173 = vector.load %arg2[%c0_176, %c0_177, %c0_178, %c0_179, %c0_180] : memref<1x4x1x8x128xf32, #tpu.memory_space<vmem>>, vector<1x1x1x8x128xf32>
    %174 = vector.shape_cast %173 : vector<1x1x1x8x128xf32> to vector<8x128xf32>
    %175 = vector.broadcast %172 : f32 to vector<8x128xf32>
    %176 = arith.mulf %175, %174 : vector<8x128xf32>
    %177 = arith.addf %171, %176 : vector<8x128xf32>
    %c3_181 = arith.constant 3 : index
    %c1_182 = arith.constant 1 : index
    %178 = memref.load %arg4[%c3_181, %c1_182] : memref<8x4xf32, #tpu.memory_space<smem>>
    %c0_183 = arith.constant 0 : index
    %c1_184 = arith.constant 1 : index
    %c0_185 = arith.constant 0 : index
    %c0_186 = arith.constant 0 : index
    %c0_187 = arith.constant 0 : index
    %179 = vector.load %arg2[%c0_183, %c1_184, %c0_185, %c0_186, %c0_187] : memref<1x4x1x8x128xf32, #tpu.memory_space<vmem>>, vector<1x1x1x8x128xf32>
    %180 = vector.shape_cast %179 : vector<1x1x1x8x128xf32> to vector<8x128xf32>
    %181 = vector.broadcast %178 : f32 to vector<8x128xf32>
    %182 = arith.mulf %181, %180 : vector<8x128xf32>
    %183 = arith.addf %177, %182 : vector<8x128xf32>
    %c3_188 = arith.constant 3 : index
    %c2_189 = arith.constant 2 : index
    %184 = memref.load %arg4[%c3_188, %c2_189] : memref<8x4xf32, #tpu.memory_space<smem>>
    %c0_190 = arith.constant 0 : index
    %c2_191 = arith.constant 2 : index
    %c0_192 = arith.constant 0 : index
    %c0_193 = arith.constant 0 : index
    %c0_194 = arith.constant 0 : index
    %185 = vector.load %arg2[%c0_190, %c2_191, %c0_192, %c0_193, %c0_194] : memref<1x4x1x8x128xf32, #tpu.memory_space<vmem>>, vector<1x1x1x8x128xf32>
    %186 = vector.shape_cast %185 : vector<1x1x1x8x128xf32> to vector<8x128xf32>
    %187 = vector.broadcast %184 : f32 to vector<8x128xf32>
    %188 = arith.mulf %187, %186 : vector<8x128xf32>
    %189 = arith.addf %183, %188 : vector<8x128xf32>
    %c3_195 = arith.constant 3 : index
    %c3_196 = arith.constant 3 : index
    %190 = memref.load %arg4[%c3_195, %c3_196] : memref<8x4xf32, #tpu.memory_space<smem>>
    %c0_197 = arith.constant 0 : index
    %c3_198 = arith.constant 3 : index
    %c0_199 = arith.constant 0 : index
    %c0_200 = arith.constant 0 : index
    %c0_201 = arith.constant 0 : index
    %191 = vector.load %arg2[%c0_197, %c3_198, %c0_199, %c0_200, %c0_201] : memref<1x4x1x8x128xf32, #tpu.memory_space<vmem>>, vector<1x1x1x8x128xf32>
    %192 = vector.shape_cast %191 : vector<1x1x1x8x128xf32> to vector<8x128xf32>
    %193 = vector.broadcast %190 : f32 to vector<8x128xf32>
    %194 = arith.mulf %193, %192 : vector<8x128xf32>
    %195 = arith.addf %189, %194 : vector<8x128xf32>
    %c3_202 = arith.constant 3 : index
    %c0_203 = arith.constant 0 : index
    %196 = memref.load %arg5[%c3_202, %c0_203] : memref<8x4xf32, #tpu.memory_space<smem>>
    %c0_204 = arith.constant 0 : index
    %c0_205 = arith.constant 0 : index
    %c0_206 = arith.constant 0 : index
    %c0_207 = arith.constant 0 : index
    %c0_208 = arith.constant 0 : index
    %197 = vector.load %arg3[%c0_204, %c0_205, %c0_206, %c0_207, %c0_208] : memref<1x4x1x8x128xf32, #tpu.memory_space<vmem>>, vector<1x1x1x8x128xf32>
    %198 = vector.shape_cast %197 : vector<1x1x1x8x128xf32> to vector<8x128xf32>
    %199 = vector.broadcast %196 : f32 to vector<8x128xf32>
    %200 = arith.mulf %199, %198 : vector<8x128xf32>
    %201 = arith.addf %195, %200 : vector<8x128xf32>
    %c3_209 = arith.constant 3 : index
    %c1_210 = arith.constant 1 : index
    %202 = memref.load %arg5[%c3_209, %c1_210] : memref<8x4xf32, #tpu.memory_space<smem>>
    %c0_211 = arith.constant 0 : index
    %c1_212 = arith.constant 1 : index
    %c0_213 = arith.constant 0 : index
    %c0_214 = arith.constant 0 : index
    %c0_215 = arith.constant 0 : index
    %203 = vector.load %arg3[%c0_211, %c1_212, %c0_213, %c0_214, %c0_215] : memref<1x4x1x8x128xf32, #tpu.memory_space<vmem>>, vector<1x1x1x8x128xf32>
    %204 = vector.shape_cast %203 : vector<1x1x1x8x128xf32> to vector<8x128xf32>
    %205 = vector.broadcast %202 : f32 to vector<8x128xf32>
    %206 = arith.mulf %205, %204 : vector<8x128xf32>
    %207 = arith.addf %201, %206 : vector<8x128xf32>
    %c3_216 = arith.constant 3 : index
    %c2_217 = arith.constant 2 : index
    %208 = memref.load %arg5[%c3_216, %c2_217] : memref<8x4xf32, #tpu.memory_space<smem>>
    %c0_218 = arith.constant 0 : index
    %c2_219 = arith.constant 2 : index
    %c0_220 = arith.constant 0 : index
    %c0_221 = arith.constant 0 : index
    %c0_222 = arith.constant 0 : index
    %209 = vector.load %arg3[%c0_218, %c2_219, %c0_220, %c0_221, %c0_222] : memref<1x4x1x8x128xf32, #tpu.memory_space<vmem>>, vector<1x1x1x8x128xf32>
    %210 = vector.shape_cast %209 : vector<1x1x1x8x128xf32> to vector<8x128xf32>
    %211 = vector.broadcast %208 : f32 to vector<8x128xf32>
    %212 = arith.mulf %211, %210 : vector<8x128xf32>
    %213 = arith.addf %207, %212 : vector<8x128xf32>
    %c3_223 = arith.constant 3 : index
    %c3_224 = arith.constant 3 : index
    %214 = memref.load %arg5[%c3_223, %c3_224] : memref<8x4xf32, #tpu.memory_space<smem>>
    %c0_225 = arith.constant 0 : index
    %c3_226 = arith.constant 3 : index
    %c0_227 = arith.constant 0 : index
    %c0_228 = arith.constant 0 : index
    %c0_229 = arith.constant 0 : index
    %215 = vector.load %arg3[%c0_225, %c3_226, %c0_227, %c0_228, %c0_229] : memref<1x4x1x8x128xf32, #tpu.memory_space<vmem>>, vector<1x1x1x8x128xf32>
    %216 = vector.shape_cast %215 : vector<1x1x1x8x128xf32> to vector<8x128xf32>
    %217 = vector.broadcast %214 : f32 to vector<8x128xf32>
    %218 = arith.mulf %217, %216 : vector<8x128xf32>
    %219 = arith.addf %213, %218 : vector<8x128xf32>
    %c3_230 = arith.constant 3 : index
    %220 = memref.load %arg7[%c3_230] : memref<8xf32, #tpu.memory_space<smem>>
    %cst_231 = arith.constant 0.000000e+00 : f32
    %221 = vector.broadcast %cst_231 : f32 to vector<8x128xf32>
    %222 = arith.maximumf %219, %221 : vector<8x128xf32>
    %223 = vector.broadcast %220 : f32 to vector<8x128xf32>
    %224 = arith.mulf %223, %222 : vector<8x128xf32>
    %225 = arith.addf %169, %224 : vector<8x128xf32>
    %c4 = arith.constant 4 : index
    %226 = memref.load %arg6[%c4] : memref<8xf32, #tpu.memory_space<smem>>
    %227 = vector.broadcast %226 : f32 to vector<8x128xf32>
    %c4_232 = arith.constant 4 : index
    %c0_233 = arith.constant 0 : index
    %228 = memref.load %arg4[%c4_232, %c0_233] : memref<8x4xf32, #tpu.memory_space<smem>>
    %c0_234 = arith.constant 0 : index
    %c0_235 = arith.constant 0 : index
    %c0_236 = arith.constant 0 : index
    %c0_237 = arith.constant 0 : index
    %c0_238 = arith.constant 0 : index
    %229 = vector.load %arg2[%c0_234, %c0_235, %c0_236, %c0_237, %c0_238] : memref<1x4x1x8x128xf32, #tpu.memory_space<vmem>>, vector<1x1x1x8x128xf32>
    %230 = vector.shape_cast %229 : vector<1x1x1x8x128xf32> to vector<8x128xf32>
    %231 = vector.broadcast %228 : f32 to vector<8x128xf32>
    %232 = arith.mulf %231, %230 : vector<8x128xf32>
    %233 = arith.addf %227, %232 : vector<8x128xf32>
    %c4_239 = arith.constant 4 : index
    %c1_240 = arith.constant 1 : index
    %234 = memref.load %arg4[%c4_239, %c1_240] : memref<8x4xf32, #tpu.memory_space<smem>>
    %c0_241 = arith.constant 0 : index
    %c1_242 = arith.constant 1 : index
    %c0_243 = arith.constant 0 : index
    %c0_244 = arith.constant 0 : index
    %c0_245 = arith.constant 0 : index
    %235 = vector.load %arg2[%c0_241, %c1_242, %c0_243, %c0_244, %c0_245] : memref<1x4x1x8x128xf32, #tpu.memory_space<vmem>>, vector<1x1x1x8x128xf32>
    %236 = vector.shape_cast %235 : vector<1x1x1x8x128xf32> to vector<8x128xf32>
    %237 = vector.broadcast %234 : f32 to vector<8x128xf32>
    %238 = arith.mulf %237, %236 : vector<8x128xf32>
    %239 = arith.addf %233, %238 : vector<8x128xf32>
    %c4_246 = arith.constant 4 : index
    %c2_247 = arith.constant 2 : index
    %240 = memref.load %arg4[%c4_246, %c2_247] : memref<8x4xf32, #tpu.memory_space<smem>>
    %c0_248 = arith.constant 0 : index
    %c2_249 = arith.constant 2 : index
    %c0_250 = arith.constant 0 : index
    %c0_251 = arith.constant 0 : index
    %c0_252 = arith.constant 0 : index
    %241 = vector.load %arg2[%c0_248, %c2_249, %c0_250, %c0_251, %c0_252] : memref<1x4x1x8x128xf32, #tpu.memory_space<vmem>>, vector<1x1x1x8x128xf32>
    %242 = vector.shape_cast %241 : vector<1x1x1x8x128xf32> to vector<8x128xf32>
    %243 = vector.broadcast %240 : f32 to vector<8x128xf32>
    %244 = arith.mulf %243, %242 : vector<8x128xf32>
    %245 = arith.addf %239, %244 : vector<8x128xf32>
    %c4_253 = arith.constant 4 : index
    %c3_254 = arith.constant 3 : index
    %246 = memref.load %arg4[%c4_253, %c3_254] : memref<8x4xf32, #tpu.memory_space<smem>>
    %c0_255 = arith.constant 0 : index
    %c3_256 = arith.constant 3 : index
    %c0_257 = arith.constant 0 : index
    %c0_258 = arith.constant 0 : index
    %c0_259 = arith.constant 0 : index
    %247 = vector.load %arg2[%c0_255, %c3_256, %c0_257, %c0_258, %c0_259] : memref<1x4x1x8x128xf32, #tpu.memory_space<vmem>>, vector<1x1x1x8x128xf32>
    %248 = vector.shape_cast %247 : vector<1x1x1x8x128xf32> to vector<8x128xf32>
    %249 = vector.broadcast %246 : f32 to vector<8x128xf32>
    %250 = arith.mulf %249, %248 : vector<8x128xf32>
    %251 = arith.addf %245, %250 : vector<8x128xf32>
    %c4_260 = arith.constant 4 : index
    %c0_261 = arith.constant 0 : index
    %252 = memref.load %arg5[%c4_260, %c0_261] : memref<8x4xf32, #tpu.memory_space<smem>>
    %c0_262 = arith.constant 0 : index
    %c0_263 = arith.constant 0 : index
    %c0_264 = arith.constant 0 : index
    %c0_265 = arith.constant 0 : index
    %c0_266 = arith.constant 0 : index
    %253 = vector.load %arg3[%c0_262, %c0_263, %c0_264, %c0_265, %c0_266] : memref<1x4x1x8x128xf32, #tpu.memory_space<vmem>>, vector<1x1x1x8x128xf32>
    %254 = vector.shape_cast %253 : vector<1x1x1x8x128xf32> to vector<8x128xf32>
    %255 = vector.broadcast %252 : f32 to vector<8x128xf32>
    %256 = arith.mulf %255, %254 : vector<8x128xf32>
    %257 = arith.addf %251, %256 : vector<8x128xf32>
    %c4_267 = arith.constant 4 : index
    %c1_268 = arith.constant 1 : index
    %258 = memref.load %arg5[%c4_267, %c1_268] : memref<8x4xf32, #tpu.memory_space<smem>>
    %c0_269 = arith.constant 0 : index
    %c1_270 = arith.constant 1 : index
    %c0_271 = arith.constant 0 : index
    %c0_272 = arith.constant 0 : index
    %c0_273 = arith.constant 0 : index
    %259 = vector.load %arg3[%c0_269, %c1_270, %c0_271, %c0_272, %c0_273] : memref<1x4x1x8x128xf32, #tpu.memory_space<vmem>>, vector<1x1x1x8x128xf32>
    %260 = vector.shape_cast %259 : vector<1x1x1x8x128xf32> to vector<8x128xf32>
    %261 = vector.broadcast %258 : f32 to vector<8x128xf32>
    %262 = arith.mulf %261, %260 : vector<8x128xf32>
    %263 = arith.addf %257, %262 : vector<8x128xf32>
    %c4_274 = arith.constant 4 : index
    %c2_275 = arith.constant 2 : index
    %264 = memref.load %arg5[%c4_274, %c2_275] : memref<8x4xf32, #tpu.memory_space<smem>>
    %c0_276 = arith.constant 0 : index
    %c2_277 = arith.constant 2 : index
    %c0_278 = arith.constant 0 : index
    %c0_279 = arith.constant 0 : index
    %c0_280 = arith.constant 0 : index
    %265 = vector.load %arg3[%c0_276, %c2_277, %c0_278, %c0_279, %c0_280] : memref<1x4x1x8x128xf32, #tpu.memory_space<vmem>>, vector<1x1x1x8x128xf32>
    %266 = vector.shape_cast %265 : vector<1x1x1x8x128xf32> to vector<8x128xf32>
    %267 = vector.broadcast %264 : f32 to vector<8x128xf32>
    %268 = arith.mulf %267, %266 : vector<8x128xf32>
    %269 = arith.addf %263, %268 : vector<8x128xf32>
    %c4_281 = arith.constant 4 : index
    %c3_282 = arith.constant 3 : index
    %270 = memref.load %arg5[%c4_281, %c3_282] : memref<8x4xf32, #tpu.memory_space<smem>>
    %c0_283 = arith.constant 0 : index
    %c3_284 = arith.constant 3 : index
    %c0_285 = arith.constant 0 : index
    %c0_286 = arith.constant 0 : index
    %c0_287 = arith.constant 0 : index
    %271 = vector.load %arg3[%c0_283, %c3_284, %c0_285, %c0_286, %c0_287] : memref<1x4x1x8x128xf32, #tpu.memory_space<vmem>>, vector<1x1x1x8x128xf32>
    %272 = vector.shape_cast %271 : vector<1x1x1x8x128xf32> to vector<8x128xf32>
    %273 = vector.broadcast %270 : f32 to vector<8x128xf32>
    %274 = arith.mulf %273, %272 : vector<8x128xf32>
    %275 = arith.addf %269, %274 : vector<8x128xf32>
    %c4_288 = arith.constant 4 : index
    %276 = memref.load %arg7[%c4_288] : memref<8xf32, #tpu.memory_space<smem>>
    %cst_289 = arith.constant 0.000000e+00 : f32
    %277 = vector.broadcast %cst_289 : f32 to vector<8x128xf32>
    %278 = arith.maximumf %275, %277 : vector<8x128xf32>
    %279 = vector.broadcast %276 : f32 to vector<8x128xf32>
    %280 = arith.mulf %279, %278 : vector<8x128xf32>
    %281 = arith.addf %225, %280 : vector<8x128xf32>
    %c5 = arith.constant 5 : index
    %282 = memref.load %arg6[%c5] : memref<8xf32, #tpu.memory_space<smem>>
    %283 = vector.broadcast %282 : f32 to vector<8x128xf32>
    %c5_290 = arith.constant 5 : index
    %c0_291 = arith.constant 0 : index
    %284 = memref.load %arg4[%c5_290, %c0_291] : memref<8x4xf32, #tpu.memory_space<smem>>
    %c0_292 = arith.constant 0 : index
    %c0_293 = arith.constant 0 : index
    %c0_294 = arith.constant 0 : index
    %c0_295 = arith.constant 0 : index
    %c0_296 = arith.constant 0 : index
    %285 = vector.load %arg2[%c0_292, %c0_293, %c0_294, %c0_295, %c0_296] : memref<1x4x1x8x128xf32, #tpu.memory_space<vmem>>, vector<1x1x1x8x128xf32>
    %286 = vector.shape_cast %285 : vector<1x1x1x8x128xf32> to vector<8x128xf32>
    %287 = vector.broadcast %284 : f32 to vector<8x128xf32>
    %288 = arith.mulf %287, %286 : vector<8x128xf32>
    %289 = arith.addf %283, %288 : vector<8x128xf32>
    %c5_297 = arith.constant 5 : index
    %c1_298 = arith.constant 1 : index
    %290 = memref.load %arg4[%c5_297, %c1_298] : memref<8x4xf32, #tpu.memory_space<smem>>
    %c0_299 = arith.constant 0 : index
    %c1_300 = arith.constant 1 : index
    %c0_301 = arith.constant 0 : index
    %c0_302 = arith.constant 0 : index
    %c0_303 = arith.constant 0 : index
    %291 = vector.load %arg2[%c0_299, %c1_300, %c0_301, %c0_302, %c0_303] : memref<1x4x1x8x128xf32, #tpu.memory_space<vmem>>, vector<1x1x1x8x128xf32>
    %292 = vector.shape_cast %291 : vector<1x1x1x8x128xf32> to vector<8x128xf32>
    %293 = vector.broadcast %290 : f32 to vector<8x128xf32>
    %294 = arith.mulf %293, %292 : vector<8x128xf32>
    %295 = arith.addf %289, %294 : vector<8x128xf32>
    %c5_304 = arith.constant 5 : index
    %c2_305 = arith.constant 2 : index
    %296 = memref.load %arg4[%c5_304, %c2_305] : memref<8x4xf32, #tpu.memory_space<smem>>
    %c0_306 = arith.constant 0 : index
    %c2_307 = arith.constant 2 : index
    %c0_308 = arith.constant 0 : index
    %c0_309 = arith.constant 0 : index
    %c0_310 = arith.constant 0 : index
    %297 = vector.load %arg2[%c0_306, %c2_307, %c0_308, %c0_309, %c0_310] : memref<1x4x1x8x128xf32, #tpu.memory_space<vmem>>, vector<1x1x1x8x128xf32>
    %298 = vector.shape_cast %297 : vector<1x1x1x8x128xf32> to vector<8x128xf32>
    %299 = vector.broadcast %296 : f32 to vector<8x128xf32>
    %300 = arith.mulf %299, %298 : vector<8x128xf32>
    %301 = arith.addf %295, %300 : vector<8x128xf32>
    %c5_311 = arith.constant 5 : index
    %c3_312 = arith.constant 3 : index
    %302 = memref.load %arg4[%c5_311, %c3_312] : memref<8x4xf32, #tpu.memory_space<smem>>
    %c0_313 = arith.constant 0 : index
    %c3_314 = arith.constant 3 : index
    %c0_315 = arith.constant 0 : index
    %c0_316 = arith.constant 0 : index
    %c0_317 = arith.constant 0 : index
    %303 = vector.load %arg2[%c0_313, %c3_314, %c0_315, %c0_316, %c0_317] : memref<1x4x1x8x128xf32, #tpu.memory_space<vmem>>, vector<1x1x1x8x128xf32>
    %304 = vector.shape_cast %303 : vector<1x1x1x8x128xf32> to vector<8x128xf32>
    %305 = vector.broadcast %302 : f32 to vector<8x128xf32>
    %306 = arith.mulf %305, %304 : vector<8x128xf32>
    %307 = arith.addf %301, %306 : vector<8x128xf32>
    %c5_318 = arith.constant 5 : index
    %c0_319 = arith.constant 0 : index
    %308 = memref.load %arg5[%c5_318, %c0_319] : memref<8x4xf32, #tpu.memory_space<smem>>
    %c0_320 = arith.constant 0 : index
    %c0_321 = arith.constant 0 : index
    %c0_322 = arith.constant 0 : index
    %c0_323 = arith.constant 0 : index
    %c0_324 = arith.constant 0 : index
    %309 = vector.load %arg3[%c0_320, %c0_321, %c0_322, %c0_323, %c0_324] : memref<1x4x1x8x128xf32, #tpu.memory_space<vmem>>, vector<1x1x1x8x128xf32>
    %310 = vector.shape_cast %309 : vector<1x1x1x8x128xf32> to vector<8x128xf32>
    %311 = vector.broadcast %308 : f32 to vector<8x128xf32>
    %312 = arith.mulf %311, %310 : vector<8x128xf32>
    %313 = arith.addf %307, %312 : vector<8x128xf32>
    %c5_325 = arith.constant 5 : index
    %c1_326 = arith.constant 1 : index
    %314 = memref.load %arg5[%c5_325, %c1_326] : memref<8x4xf32, #tpu.memory_space<smem>>
    %c0_327 = arith.constant 0 : index
    %c1_328 = arith.constant 1 : index
    %c0_329 = arith.constant 0 : index
    %c0_330 = arith.constant 0 : index
    %c0_331 = arith.constant 0 : index
    %315 = vector.load %arg3[%c0_327, %c1_328, %c0_329, %c0_330, %c0_331] : memref<1x4x1x8x128xf32, #tpu.memory_space<vmem>>, vector<1x1x1x8x128xf32>
    %316 = vector.shape_cast %315 : vector<1x1x1x8x128xf32> to vector<8x128xf32>
    %317 = vector.broadcast %314 : f32 to vector<8x128xf32>
    %318 = arith.mulf %317, %316 : vector<8x128xf32>
    %319 = arith.addf %313, %318 : vector<8x128xf32>
    %c5_332 = arith.constant 5 : index
    %c2_333 = arith.constant 2 : index
    %320 = memref.load %arg5[%c5_332, %c2_333] : memref<8x4xf32, #tpu.memory_space<smem>>
    %c0_334 = arith.constant 0 : index
    %c2_335 = arith.constant 2 : index
    %c0_336 = arith.constant 0 : index
    %c0_337 = arith.constant 0 : index
    %c0_338 = arith.constant 0 : index
    %321 = vector.load %arg3[%c0_334, %c2_335, %c0_336, %c0_337, %c0_338] : memref<1x4x1x8x128xf32, #tpu.memory_space<vmem>>, vector<1x1x1x8x128xf32>
    %322 = vector.shape_cast %321 : vector<1x1x1x8x128xf32> to vector<8x128xf32>
    %323 = vector.broadcast %320 : f32 to vector<8x128xf32>
    %324 = arith.mulf %323, %322 : vector<8x128xf32>
    %325 = arith.addf %319, %324 : vector<8x128xf32>
    %c5_339 = arith.constant 5 : index
    %c3_340 = arith.constant 3 : index
    %326 = memref.load %arg5[%c5_339, %c3_340] : memref<8x4xf32, #tpu.memory_space<smem>>
    %c0_341 = arith.constant 0 : index
    %c3_342 = arith.constant 3 : index
    %c0_343 = arith.constant 0 : index
    %c0_344 = arith.constant 0 : index
    %c0_345 = arith.constant 0 : index
    %327 = vector.load %arg3[%c0_341, %c3_342, %c0_343, %c0_344, %c0_345] : memref<1x4x1x8x128xf32, #tpu.memory_space<vmem>>, vector<1x1x1x8x128xf32>
    %328 = vector.shape_cast %327 : vector<1x1x1x8x128xf32> to vector<8x128xf32>
    %329 = vector.broadcast %326 : f32 to vector<8x128xf32>
    %330 = arith.mulf %329, %328 : vector<8x128xf32>
    %331 = arith.addf %325, %330 : vector<8x128xf32>
    %c5_346 = arith.constant 5 : index
    %332 = memref.load %arg7[%c5_346] : memref<8xf32, #tpu.memory_space<smem>>
    %cst_347 = arith.constant 0.000000e+00 : f32
    %333 = vector.broadcast %cst_347 : f32 to vector<8x128xf32>
    %334 = arith.maximumf %331, %333 : vector<8x128xf32>
    %335 = vector.broadcast %332 : f32 to vector<8x128xf32>
    %336 = arith.mulf %335, %334 : vector<8x128xf32>
    %337 = arith.addf %281, %336 : vector<8x128xf32>
    %c6 = arith.constant 6 : index
    %338 = memref.load %arg6[%c6] : memref<8xf32, #tpu.memory_space<smem>>
    %339 = vector.broadcast %338 : f32 to vector<8x128xf32>
    %c6_348 = arith.constant 6 : index
    %c0_349 = arith.constant 0 : index
    %340 = memref.load %arg4[%c6_348, %c0_349] : memref<8x4xf32, #tpu.memory_space<smem>>
    %c0_350 = arith.constant 0 : index
    %c0_351 = arith.constant 0 : index
    %c0_352 = arith.constant 0 : index
    %c0_353 = arith.constant 0 : index
    %c0_354 = arith.constant 0 : index
    %341 = vector.load %arg2[%c0_350, %c0_351, %c0_352, %c0_353, %c0_354] : memref<1x4x1x8x128xf32, #tpu.memory_space<vmem>>, vector<1x1x1x8x128xf32>
    %342 = vector.shape_cast %341 : vector<1x1x1x8x128xf32> to vector<8x128xf32>
    %343 = vector.broadcast %340 : f32 to vector<8x128xf32>
    %344 = arith.mulf %343, %342 : vector<8x128xf32>
    %345 = arith.addf %339, %344 : vector<8x128xf32>
    %c6_355 = arith.constant 6 : index
    %c1_356 = arith.constant 1 : index
    %346 = memref.load %arg4[%c6_355, %c1_356] : memref<8x4xf32, #tpu.memory_space<smem>>
    %c0_357 = arith.constant 0 : index
    %c1_358 = arith.constant 1 : index
    %c0_359 = arith.constant 0 : index
    %c0_360 = arith.constant 0 : index
    %c0_361 = arith.constant 0 : index
    %347 = vector.load %arg2[%c0_357, %c1_358, %c0_359, %c0_360, %c0_361] : memref<1x4x1x8x128xf32, #tpu.memory_space<vmem>>, vector<1x1x1x8x128xf32>
    %348 = vector.shape_cast %347 : vector<1x1x1x8x128xf32> to vector<8x128xf32>
    %349 = vector.broadcast %346 : f32 to vector<8x128xf32>
    %350 = arith.mulf %349, %348 : vector<8x128xf32>
    %351 = arith.addf %345, %350 : vector<8x128xf32>
    %c6_362 = arith.constant 6 : index
    %c2_363 = arith.constant 2 : index
    %352 = memref.load %arg4[%c6_362, %c2_363] : memref<8x4xf32, #tpu.memory_space<smem>>
    %c0_364 = arith.constant 0 : index
    %c2_365 = arith.constant 2 : index
    %c0_366 = arith.constant 0 : index
    %c0_367 = arith.constant 0 : index
    %c0_368 = arith.constant 0 : index
    %353 = vector.load %arg2[%c0_364, %c2_365, %c0_366, %c0_367, %c0_368] : memref<1x4x1x8x128xf32, #tpu.memory_space<vmem>>, vector<1x1x1x8x128xf32>
    %354 = vector.shape_cast %353 : vector<1x1x1x8x128xf32> to vector<8x128xf32>
    %355 = vector.broadcast %352 : f32 to vector<8x128xf32>
    %356 = arith.mulf %355, %354 : vector<8x128xf32>
    %357 = arith.addf %351, %356 : vector<8x128xf32>
    %c6_369 = arith.constant 6 : index
    %c3_370 = arith.constant 3 : index
    %358 = memref.load %arg4[%c6_369, %c3_370] : memref<8x4xf32, #tpu.memory_space<smem>>
    %c0_371 = arith.constant 0 : index
    %c3_372 = arith.constant 3 : index
    %c0_373 = arith.constant 0 : index
    %c0_374 = arith.constant 0 : index
    %c0_375 = arith.constant 0 : index
    %359 = vector.load %arg2[%c0_371, %c3_372, %c0_373, %c0_374, %c0_375] : memref<1x4x1x8x128xf32, #tpu.memory_space<vmem>>, vector<1x1x1x8x128xf32>
    %360 = vector.shape_cast %359 : vector<1x1x1x8x128xf32> to vector<8x128xf32>
    %361 = vector.broadcast %358 : f32 to vector<8x128xf32>
    %362 = arith.mulf %361, %360 : vector<8x128xf32>
    %363 = arith.addf %357, %362 : vector<8x128xf32>
    %c6_376 = arith.constant 6 : index
    %c0_377 = arith.constant 0 : index
    %364 = memref.load %arg5[%c6_376, %c0_377] : memref<8x4xf32, #tpu.memory_space<smem>>
    %c0_378 = arith.constant 0 : index
    %c0_379 = arith.constant 0 : index
    %c0_380 = arith.constant 0 : index
    %c0_381 = arith.constant 0 : index
    %c0_382 = arith.constant 0 : index
    %365 = vector.load %arg3[%c0_378, %c0_379, %c0_380, %c0_381, %c0_382] : memref<1x4x1x8x128xf32, #tpu.memory_space<vmem>>, vector<1x1x1x8x128xf32>
    %366 = vector.shape_cast %365 : vector<1x1x1x8x128xf32> to vector<8x128xf32>
    %367 = vector.broadcast %364 : f32 to vector<8x128xf32>
    %368 = arith.mulf %367, %366 : vector<8x128xf32>
    %369 = arith.addf %363, %368 : vector<8x128xf32>
    %c6_383 = arith.constant 6 : index
    %c1_384 = arith.constant 1 : index
    %370 = memref.load %arg5[%c6_383, %c1_384] : memref<8x4xf32, #tpu.memory_space<smem>>
    %c0_385 = arith.constant 0 : index
    %c1_386 = arith.constant 1 : index
    %c0_387 = arith.constant 0 : index
    %c0_388 = arith.constant 0 : index
    %c0_389 = arith.constant 0 : index
    %371 = vector.load %arg3[%c0_385, %c1_386, %c0_387, %c0_388, %c0_389] : memref<1x4x1x8x128xf32, #tpu.memory_space<vmem>>, vector<1x1x1x8x128xf32>
    %372 = vector.shape_cast %371 : vector<1x1x1x8x128xf32> to vector<8x128xf32>
    %373 = vector.broadcast %370 : f32 to vector<8x128xf32>
    %374 = arith.mulf %373, %372 : vector<8x128xf32>
    %375 = arith.addf %369, %374 : vector<8x128xf32>
    %c6_390 = arith.constant 6 : index
    %c2_391 = arith.constant 2 : index
    %376 = memref.load %arg5[%c6_390, %c2_391] : memref<8x4xf32, #tpu.memory_space<smem>>
    %c0_392 = arith.constant 0 : index
    %c2_393 = arith.constant 2 : index
    %c0_394 = arith.constant 0 : index
    %c0_395 = arith.constant 0 : index
    %c0_396 = arith.constant 0 : index
    %377 = vector.load %arg3[%c0_392, %c2_393, %c0_394, %c0_395, %c0_396] : memref<1x4x1x8x128xf32, #tpu.memory_space<vmem>>, vector<1x1x1x8x128xf32>
    %378 = vector.shape_cast %377 : vector<1x1x1x8x128xf32> to vector<8x128xf32>
    %379 = vector.broadcast %376 : f32 to vector<8x128xf32>
    %380 = arith.mulf %379, %378 : vector<8x128xf32>
    %381 = arith.addf %375, %380 : vector<8x128xf32>
    %c6_397 = arith.constant 6 : index
    %c3_398 = arith.constant 3 : index
    %382 = memref.load %arg5[%c6_397, %c3_398] : memref<8x4xf32, #tpu.memory_space<smem>>
    %c0_399 = arith.constant 0 : index
    %c3_400 = arith.constant 3 : index
    %c0_401 = arith.constant 0 : index
    %c0_402 = arith.constant 0 : index
    %c0_403 = arith.constant 0 : index
    %383 = vector.load %arg3[%c0_399, %c3_400, %c0_401, %c0_402, %c0_403] : memref<1x4x1x8x128xf32, #tpu.memory_space<vmem>>, vector<1x1x1x8x128xf32>
    %384 = vector.shape_cast %383 : vector<1x1x1x8x128xf32> to vector<8x128xf32>
    %385 = vector.broadcast %382 : f32 to vector<8x128xf32>
    %386 = arith.mulf %385, %384 : vector<8x128xf32>
    %387 = arith.addf %381, %386 : vector<8x128xf32>
    %c6_404 = arith.constant 6 : index
    %388 = memref.load %arg7[%c6_404] : memref<8xf32, #tpu.memory_space<smem>>
    %cst_405 = arith.constant 0.000000e+00 : f32
    %389 = vector.broadcast %cst_405 : f32 to vector<8x128xf32>
    %390 = arith.maximumf %387, %389 : vector<8x128xf32>
    %391 = vector.broadcast %388 : f32 to vector<8x128xf32>
    %392 = arith.mulf %391, %390 : vector<8x128xf32>
    %393 = arith.addf %337, %392 : vector<8x128xf32>
    %c7 = arith.constant 7 : index
    %394 = memref.load %arg6[%c7] : memref<8xf32, #tpu.memory_space<smem>>
    %395 = vector.broadcast %394 : f32 to vector<8x128xf32>
    %c7_406 = arith.constant 7 : index
    %c0_407 = arith.constant 0 : index
    %396 = memref.load %arg4[%c7_406, %c0_407] : memref<8x4xf32, #tpu.memory_space<smem>>
    %c0_408 = arith.constant 0 : index
    %c0_409 = arith.constant 0 : index
    %c0_410 = arith.constant 0 : index
    %c0_411 = arith.constant 0 : index
    %c0_412 = arith.constant 0 : index
    %397 = vector.load %arg2[%c0_408, %c0_409, %c0_410, %c0_411, %c0_412] : memref<1x4x1x8x128xf32, #tpu.memory_space<vmem>>, vector<1x1x1x8x128xf32>
    %398 = vector.shape_cast %397 : vector<1x1x1x8x128xf32> to vector<8x128xf32>
    %399 = vector.broadcast %396 : f32 to vector<8x128xf32>
    %400 = arith.mulf %399, %398 : vector<8x128xf32>
    %401 = arith.addf %395, %400 : vector<8x128xf32>
    %c7_413 = arith.constant 7 : index
    %c1_414 = arith.constant 1 : index
    %402 = memref.load %arg4[%c7_413, %c1_414] : memref<8x4xf32, #tpu.memory_space<smem>>
    %c0_415 = arith.constant 0 : index
    %c1_416 = arith.constant 1 : index
    %c0_417 = arith.constant 0 : index
    %c0_418 = arith.constant 0 : index
    %c0_419 = arith.constant 0 : index
    %403 = vector.load %arg2[%c0_415, %c1_416, %c0_417, %c0_418, %c0_419] : memref<1x4x1x8x128xf32, #tpu.memory_space<vmem>>, vector<1x1x1x8x128xf32>
    %404 = vector.shape_cast %403 : vector<1x1x1x8x128xf32> to vector<8x128xf32>
    %405 = vector.broadcast %402 : f32 to vector<8x128xf32>
    %406 = arith.mulf %405, %404 : vector<8x128xf32>
    %407 = arith.addf %401, %406 : vector<8x128xf32>
    %c7_420 = arith.constant 7 : index
    %c2_421 = arith.constant 2 : index
    %408 = memref.load %arg4[%c7_420, %c2_421] : memref<8x4xf32, #tpu.memory_space<smem>>
    %c0_422 = arith.constant 0 : index
    %c2_423 = arith.constant 2 : index
    %c0_424 = arith.constant 0 : index
    %c0_425 = arith.constant 0 : index
    %c0_426 = arith.constant 0 : index
    %409 = vector.load %arg2[%c0_422, %c2_423, %c0_424, %c0_425, %c0_426] : memref<1x4x1x8x128xf32, #tpu.memory_space<vmem>>, vector<1x1x1x8x128xf32>
    %410 = vector.shape_cast %409 : vector<1x1x1x8x128xf32> to vector<8x128xf32>
    %411 = vector.broadcast %408 : f32 to vector<8x128xf32>
    %412 = arith.mulf %411, %410 : vector<8x128xf32>
    %413 = arith.addf %407, %412 : vector<8x128xf32>
    %c7_427 = arith.constant 7 : index
    %c3_428 = arith.constant 3 : index
    %414 = memref.load %arg4[%c7_427, %c3_428] : memref<8x4xf32, #tpu.memory_space<smem>>
    %c0_429 = arith.constant 0 : index
    %c3_430 = arith.constant 3 : index
    %c0_431 = arith.constant 0 : index
    %c0_432 = arith.constant 0 : index
    %c0_433 = arith.constant 0 : index
    %415 = vector.load %arg2[%c0_429, %c3_430, %c0_431, %c0_432, %c0_433] : memref<1x4x1x8x128xf32, #tpu.memory_space<vmem>>, vector<1x1x1x8x128xf32>
    %416 = vector.shape_cast %415 : vector<1x1x1x8x128xf32> to vector<8x128xf32>
    %417 = vector.broadcast %414 : f32 to vector<8x128xf32>
    %418 = arith.mulf %417, %416 : vector<8x128xf32>
    %419 = arith.addf %413, %418 : vector<8x128xf32>
    %c7_434 = arith.constant 7 : index
    %c0_435 = arith.constant 0 : index
    %420 = memref.load %arg5[%c7_434, %c0_435] : memref<8x4xf32, #tpu.memory_space<smem>>
    %c0_436 = arith.constant 0 : index
    %c0_437 = arith.constant 0 : index
    %c0_438 = arith.constant 0 : index
    %c0_439 = arith.constant 0 : index
    %c0_440 = arith.constant 0 : index
    %421 = vector.load %arg3[%c0_436, %c0_437, %c0_438, %c0_439, %c0_440] : memref<1x4x1x8x128xf32, #tpu.memory_space<vmem>>, vector<1x1x1x8x128xf32>
    %422 = vector.shape_cast %421 : vector<1x1x1x8x128xf32> to vector<8x128xf32>
    %423 = vector.broadcast %420 : f32 to vector<8x128xf32>
    %424 = arith.mulf %423, %422 : vector<8x128xf32>
    %425 = arith.addf %419, %424 : vector<8x128xf32>
    %c7_441 = arith.constant 7 : index
    %c1_442 = arith.constant 1 : index
    %426 = memref.load %arg5[%c7_441, %c1_442] : memref<8x4xf32, #tpu.memory_space<smem>>
    %c0_443 = arith.constant 0 : index
    %c1_444 = arith.constant 1 : index
    %c0_445 = arith.constant 0 : index
    %c0_446 = arith.constant 0 : index
    %c0_447 = arith.constant 0 : index
    %427 = vector.load %arg3[%c0_443, %c1_444, %c0_445, %c0_446, %c0_447] : memref<1x4x1x8x128xf32, #tpu.memory_space<vmem>>, vector<1x1x1x8x128xf32>
    %428 = vector.shape_cast %427 : vector<1x1x1x8x128xf32> to vector<8x128xf32>
    %429 = vector.broadcast %426 : f32 to vector<8x128xf32>
    %430 = arith.mulf %429, %428 : vector<8x128xf32>
    %431 = arith.addf %425, %430 : vector<8x128xf32>
    %c7_448 = arith.constant 7 : index
    %c2_449 = arith.constant 2 : index
    %432 = memref.load %arg5[%c7_448, %c2_449] : memref<8x4xf32, #tpu.memory_space<smem>>
    %c0_450 = arith.constant 0 : index
    %c2_451 = arith.constant 2 : index
    %c0_452 = arith.constant 0 : index
    %c0_453 = arith.constant 0 : index
    %c0_454 = arith.constant 0 : index
    %433 = vector.load %arg3[%c0_450, %c2_451, %c0_452, %c0_453, %c0_454] : memref<1x4x1x8x128xf32, #tpu.memory_space<vmem>>, vector<1x1x1x8x128xf32>
    %434 = vector.shape_cast %433 : vector<1x1x1x8x128xf32> to vector<8x128xf32>
    %435 = vector.broadcast %432 : f32 to vector<8x128xf32>
    %436 = arith.mulf %435, %434 : vector<8x128xf32>
    %437 = arith.addf %431, %436 : vector<8x128xf32>
    %c7_455 = arith.constant 7 : index
    %c3_456 = arith.constant 3 : index
    %438 = memref.load %arg5[%c7_455, %c3_456] : memref<8x4xf32, #tpu.memory_space<smem>>
    %c0_457 = arith.constant 0 : index
    %c3_458 = arith.constant 3 : index
    %c0_459 = arith.constant 0 : index
    %c0_460 = arith.constant 0 : index
    %c0_461 = arith.constant 0 : index
    %439 = vector.load %arg3[%c0_457, %c3_458, %c0_459, %c0_460, %c0_461] : memref<1x4x1x8x128xf32, #tpu.memory_space<vmem>>, vector<1x1x1x8x128xf32>
    %440 = vector.shape_cast %439 : vector<1x1x1x8x128xf32> to vector<8x128xf32>
    %441 = vector.broadcast %438 : f32 to vector<8x128xf32>
    %442 = arith.mulf %441, %440 : vector<8x128xf32>
    %443 = arith.addf %437, %442 : vector<8x128xf32>
    %c7_462 = arith.constant 7 : index
    %444 = memref.load %arg7[%c7_462] : memref<8xf32, #tpu.memory_space<smem>>
    %cst_463 = arith.constant 0.000000e+00 : f32
    %445 = vector.broadcast %cst_463 : f32 to vector<8x128xf32>
    %446 = arith.maximumf %443, %445 : vector<8x128xf32>
    %447 = vector.broadcast %444 : f32 to vector<8x128xf32>
    %448 = arith.mulf %447, %446 : vector<8x128xf32>
    %449 = arith.addf %393, %448 : vector<8x128xf32>
    %450 = arith.negf %449 : vector<8x128xf32>
    %451 = math.exp %450 : vector<8x128xf32>
    %cst_464 = arith.constant 1.000000e+00 : f32
    %452 = vector.broadcast %cst_464 : f32 to vector<8x128xf32>
    %453 = arith.addf %452, %451 : vector<8x128xf32>
    %454 = arith.divf %452, %453 : vector<8x128xf32>
    %c0_465 = arith.constant 0 : index
    %c0_466 = arith.constant 0 : index
    %c0_467 = arith.constant 0 : index
    %c0_468 = arith.constant 0 : index
    %c0_469 = arith.constant 0 : index
    %455 = vector.load %arg3[%c0_465, %c0_466, %c0_467, %c0_468, %c0_469] : memref<1x4x1x8x128xf32, #tpu.memory_space<vmem>>, vector<1x1x1x8x128xf32>
    %456 = vector.shape_cast %455 : vector<1x1x1x8x128xf32> to vector<8x128xf32>
    %457 = arith.mulf %456, %454 : vector<8x128xf32>
    %c0_470 = arith.constant 0 : index
    %c0_471 = arith.constant 0 : index
    %c0_472 = arith.constant 0 : index
    %c0_473 = arith.constant 0 : index
    %c0_474 = arith.constant 0 : index
    %458 = vector.load %arg9[%c0_470, %c0_471, %c0_472, %c0_473, %c0_474] : memref<1x4x1x8x128xf32, #tpu.memory_space<vmem>>, vector<1x1x1x8x128xf32>
    %459 = vector.shape_cast %458 : vector<1x1x1x8x128xf32> to vector<8x128xf32>
    %460 = vector.shape_cast %457 : vector<8x128xf32> to vector<1x1x1x8x128xf32>
    tpu.vector_store %arg9[%c0_470, %c0_471, %c0_472, %c0_473, %c0_474], %460 {strides = array<i32>} : memref<1x4x1x8x128xf32, #tpu.memory_space<vmem>>, vector<1x1x1x8x128xf32>,
    %c0_475 = arith.constant 0 : index
    %c1_476 = arith.constant 1 : index
    %c0_477 = arith.constant 0 : index
    %c0_478 = arith.constant 0 : index
    %c0_479 = arith.constant 0 : index
    %461 = vector.load %arg3[%c0_475, %c1_476, %c0_477, %c0_478, %c0_479] : memref<1x4x1x8x128xf32, #tpu.memory_space<vmem>>, vector<1x1x1x8x128xf32>
    %462 = vector.shape_cast %461 : vector<1x1x1x8x128xf32> to vector<8x128xf32>
    %463 = arith.mulf %462, %454 : vector<8x128xf32>
    %c0_480 = arith.constant 0 : index
    %c1_481 = arith.constant 1 : index
    %c0_482 = arith.constant 0 : index
    %c0_483 = arith.constant 0 : index
    %c0_484 = arith.constant 0 : index
    %464 = vector.load %arg9[%c0_480, %c1_481, %c0_482, %c0_483, %c0_484] : memref<1x4x1x8x128xf32, #tpu.memory_space<vmem>>, vector<1x1x1x8x128xf32>
    %465 = vector.shape_cast %464 : vector<1x1x1x8x128xf32> to vector<8x128xf32>
    %466 = vector.shape_cast %463 : vector<8x128xf32> to vector<1x1x1x8x128xf32>
    tpu.vector_store %arg9[%c0_480, %c1_481, %c0_482, %c0_483, %c0_484], %466 {strides = array<i32>} : memref<1x4x1x8x128xf32, #tpu.memory_space<vmem>>, vector<1x1x1x8x128xf32>,
    %c0_485 = arith.constant 0 : index
    %c2_486 = arith.constant 2 : index
    %c0_487 = arith.constant 0 : index
    %c0_488 = arith.constant 0 : index
    %c0_489 = arith.constant 0 : index
    %467 = vector.load %arg3[%c0_485, %c2_486, %c0_487, %c0_488, %c0_489] : memref<1x4x1x8x128xf32, #tpu.memory_space<vmem>>, vector<1x1x1x8x128xf32>
    %468 = vector.shape_cast %467 : vector<1x1x1x8x128xf32> to vector<8x128xf32>
    %469 = arith.mulf %468, %454 : vector<8x128xf32>
    %c0_490 = arith.constant 0 : index
    %c2_491 = arith.constant 2 : index
    %c0_492 = arith.constant 0 : index
    %c0_493 = arith.constant 0 : index
    %c0_494 = arith.constant 0 : index
    %470 = vector.load %arg9[%c0_490, %c2_491, %c0_492, %c0_493, %c0_494] : memref<1x4x1x8x128xf32, #tpu.memory_space<vmem>>, vector<1x1x1x8x128xf32>
    %471 = vector.shape_cast %470 : vector<1x1x1x8x128xf32> to vector<8x128xf32>
    %472 = vector.shape_cast %469 : vector<8x128xf32> to vector<1x1x1x8x128xf32>
    tpu.vector_store %arg9[%c0_490, %c2_491, %c0_492, %c0_493, %c0_494], %472 {strides = array<i32>} : memref<1x4x1x8x128xf32, #tpu.memory_space<vmem>>, vector<1x1x1x8x128xf32>,
    %c0_495 = arith.constant 0 : index
    %c3_496 = arith.constant 3 : index
    %c0_497 = arith.constant 0 : index
    %c0_498 = arith.constant 0 : index
    %c0_499 = arith.constant 0 : index
    %473 = vector.load %arg3[%c0_495, %c3_496, %c0_497, %c0_498, %c0_499] : memref<1x4x1x8x128xf32, #tpu.memory_space<vmem>>, vector<1x1x1x8x128xf32>
    %474 = vector.shape_cast %473 : vector<1x1x1x8x128xf32> to vector<8x128xf32>
    %475 = arith.mulf %474, %454 : vector<8x128xf32>
    %c0_500 = arith.constant 0 : index
    %c3_501 = arith.constant 3 : index
    %c0_502 = arith.constant 0 : index
    %c0_503 = arith.constant 0 : index
    %c0_504 = arith.constant 0 : index
    %476 = vector.load %arg9[%c0_500, %c3_501, %c0_502, %c0_503, %c0_504] : memref<1x4x1x8x128xf32, #tpu.memory_space<vmem>>, vector<1x1x1x8x128xf32>
    %477 = vector.shape_cast %476 : vector<1x1x1x8x128xf32> to vector<8x128xf32>
    %478 = vector.shape_cast %475 : vector<8x128xf32> to vector<1x1x1x8x128xf32>
    tpu.vector_store %arg9[%c0_500, %c3_501, %c0_502, %c0_503, %c0_504], %478 {strides = array<i32>} : memref<1x4x1x8x128xf32, #tpu.memory_space<vmem>>, vector<1x1x1x8x128xf32>,
    return
  }
  func.func @transform_0(%arg0: i32, %arg1: i32) -> (i32, i32, i32, i32, i32) {
    %c0_i32 = arith.constant 0 : i32
    %c0_i32_0 = arith.constant 0 : i32
    %c0_i32_1 = arith.constant 0 : i32
    %c0_i32_2 = arith.constant 0 : i32
    return %arg0, %c0_i32, %arg1, %c0_i32_0, %c0_i32_1 : i32, i32, i32, i32, i32
  }
  func.func @transform_1(%arg0: i32, %arg1: i32) -> (i32, i32, i32, i32, i32) {
    %c0_i32 = arith.constant 0 : i32
    %c0_i32_0 = arith.constant 0 : i32
    %c0_i32_1 = arith.constant 0 : i32
    %c0_i32_2 = arith.constant 0 : i32
    return %arg0, %c0_i32, %arg1, %c0_i32_0, %c0_i32_1 : i32, i32, i32, i32, i32
  }
  func.func @transform_2(%arg0: i32, %arg1: i32) -> (i32, i32) {
    %c0_i32 = arith.constant 0 : i32
    %c0_i32_0 = arith.constant 0 : i32
    %c0_i32_1 = arith.constant 0 : i32
    return %c0_i32, %c0_i32_0 : i32, i32
  }
  func.func @transform_3(%arg0: i32, %arg1: i32) -> (i32, i32) {
    %c0_i32 = arith.constant 0 : i32
    %c0_i32_0 = arith.constant 0 : i32
    %c0_i32_1 = arith.constant 0 : i32
    return %c0_i32, %c0_i32_0 : i32, i32
  }
  func.func @transform_4(%arg0: i32, %arg1: i32) -> i32 {
    %c0_i32 = arith.constant 0 : i32
    %c0_i32_0 = arith.constant 0 : i32
    return %c0_i32 : i32
  }
  func.func @transform_5(%arg0: i32, %arg1: i32) -> i32 {
    %c0_i32 = arith.constant 0 : i32
    %c0_i32_0 = arith.constant 0 : i32
    return %c0_i32 : i32
  }
  func.func @transform_6(%arg0: i32, %arg1: i32) -> i32 {
    %c0_i32 = arith.constant 0 : i32
    %c0_i32_0 = arith.constant 0 : i32
    return %c0_i32 : i32
  }
  func.func @transform_7(%arg0: i32, %arg1: i32) -> (i32, i32, i32, i32, i32) {
    %c0_i32 = arith.constant 0 : i32
    %c0_i32_0 = arith.constant 0 : i32
    %c0_i32_1 = arith.constant 0 : i32
    %c0_i32_2 = arith.constant 0 : i32
    return %arg0, %c0_i32, %arg1, %c0_i32_0, %c0_i32_1 : i32, i32, i32, i32, i32
  }
}

</mosaic_0001>

<bundles_post_ra>
// kernel: tpu_custom_call.1
= control target key start
LH: loop header
LB: loop body
LE: loop exit
PB: predicated region body
PF: predicated region fallthrough
CT: control target
= control target key end

     0   :  { %s1974_s0 = inlined_call_operand.hbm [shape: f32[2,4,1,8,128], index: 0, kind: input, shape index: {}]   ;;  %s1975_s1 = inlined_call_operand.hbm [shape: f32[2,4,1,8,128], index: 1, kind: input, shape index: {}]   ;;  %s1976_s2 = inlined_call_operand.vmem [shape: f32[8,4], index: 2, kind: input, shape index: {}]   ;;  %s1977_s3 = inlined_call_operand.vmem [shape: f32[8,4], index: 3, kind: input, shape index: {}]   ;;  %s1978_s4 = inlined_call_operand.vmem [shape: f32[8], index: 4, kind: input, shape index: {}]   ;;  %s1979_s5 = inlined_call_operand.vmem [shape: f32[8], index: 5, kind: input, shape index: {}]   ;;  %s1980_s6 = inlined_call_operand.<no memory space> [shape: f32[1], index: 6, kind: input, shape index: {}]   ;;  %s1981_s7 = inlined_call_operand.hbm [shape: f32[2,4,1,8,128], index: 7, kind: output, shape index: {}]  }
   0x1   :  { %1994 = sst [smem:[#allocation28_spill]] %s1974_s0 }
   0x2   :  { %1995 = sst [smem:[#allocation29_spill]] %s1975_s1 }
   0x3   :  { %1996 = sst [smem:[#allocation30_spill]] %s1976_s2 }
   0x4   :  { %1997 = sst [smem:[#allocation31_spill]] %s1977_s3 }
   0x5   :  { %1998 = sst [smem:[#allocation32_spill]] %s1978_s4 }
   0x6   :  { %1999 = sst [smem:[#allocation33_spill]] %s1979_s5 }
   0x7   :  { %12 = sst [smem:[#allocation2]] %s1980_s6 }
   0x8   :  { %13 = vsyncpa [#allocation4], 0 }
   0x9   :  { %15 = vsyncpa [#allocation4 + $0x1], 0 }
   0xa   :  { %16 = vsyncpa [#allocation8], 0 }
   0xb   :  { %18 = vsyncpa [#allocation8 + $0x1], 0 }
   0xc   :  { %19 = vsyncpa [#allocation6], 0 }
   0xd   :  { %20 = vsyncpa [#allocation11], 0 }
   0xe   :  { %21 = vsyncpa [#allocation14], 0 }
   0xf   :  { %22 = vsyncpa [#allocation5], 0 }
  0x10   :  { %24 = vsyncpa [#allocation5 + $0x1], 0  ;;  %s1427_s26 = smov 0   ;;  %s1429_s27 = smov 0  }
  0x11   :  { %s1431_s28 = smov 0   ;;  %s1433_s29 = smov 0  }
  0x12   :  { %s1435_s30 = smov 0   ;;  %s1437_s6 = smov 0  }
  0x13 LB: > { %2000 = sst [smem:[#allocation22_spill]] %s1355_s27  ;;  %s924_s8 = sadd.s32 4294967295, %s1371_s6   ;;  %s1371_s6 = sphi %s1437_s6, %s30_s6   ;;  %s1367_s30 = sphi %s1435_s30, %s2033_s30   ;;  %s1363_s29 = sphi %s1433_s29, %s2032_s29   ;;  %s1359_s28 = sphi %s1431_s28, %s2031_s28   ;;  %s1355_s27 = sphi %s1429_s27, %s2030_s27   ;;  %s1351_s26 = sphi %s1427_s26, %s2029_s26  }
  0x14   : > { %2001 = sst [smem:[#allocation23_spill]] %s1359_s28  ;;  %s925_s9 = sadd.s32 4294967294, %s1371_s6  }
  0x15   : > { %2002 = sst [smem:[#allocation24_spill]] %s1367_s30  ;;  %p64_p0 = scmp.ne.s32.totalorder %s1355_s27, %s1351_s26 }
  0x16   : > { %2003 = sst [smem:[#allocation25_spill]] %s1371_s6  ;;  %p1461_p1 = scmp.eq.s32.totalorder %s924_s8, 0 }
  0x17   : > { %p1465_p2 = scmp.eq.s32.totalorder %s924_s8, 1  ;;  %p229_p3 = scmp.eq.s32.totalorder %s925_s9, 1 }
  0x18   : > { %s2004_s10 = scalar_select %p1461_p1, 1, 0 }
  0x19   : > { %s2005_s11 = scalar_select %p1465_p2, 1, 0 }
  0x1a   : > { %p1471_p4 = por %p1461_p1, %p64_p0  ;;  %p926_p5 = scmp.ge.s32.totalorder %s1371_s6, 1 }
  0x1b   : > { %p1476_p6 = por %p229_p3, %p64_p0  ;;  %p236_p7 = scmp.lt.s32.totalorder %s1371_s6, 3 }
  0x1c   : > { %s2006_s12 = scalar_select %p1471_p4, 1, 0 }
  0x1d   : > { %s2007_s13 = scalar_select %p1476_p6, 1, 0 }
  0x1e   : > { %s2008_s3 = sld [smem:[#allocation31_spill]]  ;;  %p1484_p8 = pnand %p926_p5, %p236_p7 }
  0x1f   : > { %s2010_s2 = sld [smem:[#allocation30_spill]] }
  0x20   : > { %s2009_s17 = scalar_select %p1484_p8, 1, 0 }
  0x21   : > { %p1065_p10 = pneg %p1484_p8  ;;  %s2012_s4 = sld [smem:[#allocation32_spill]] }
  0x23   : > { %p1496_p11 = pnand %p1065_p10, %p1461_p1 }
  0x24   : > { %s260_s16 = sshll.u32 %s2008_s3, 4  ;;  %s261_s16 = int_to_ptr.vmem [resolvable:$true] %s260_s16 }
  0x25   : > { %s249_s20 = sshll.u32 %s2010_s2, 4  ;;  %s1159_s25 = scalar_lea.vmem %s261_s16, 128  ;;  %s250_s20 = int_to_ptr.vmem [resolvable:$true] %s249_s20 }
  0x26   : > { %p1160_p12 = scmp.ne.s32.totalorder %s261_s16, %s1159_s25  ;;  %p1161_p13 = pneg %p1496_p11 }
  0x27   : > { %s271_s24 = sshll.u32 %s2012_s4, 4  ;;  %p1167_p5 = scmp.lt.s32.totalorder %s261_s16, %s261_s16  ;;  %s1503_s24 = int_to_ptr.vmem [resolvable:$true] %s271_s24 }
  0x28   : > { %p1162_p0 = pnand %p1161_p13, %p1160_p12  ;;  %p1168_p7 = scmp.lt.s32.totalorder %s1159_s25, %s1159_s25 }
  0x2a   : > { %p1163_p3 = pneg %p1162_p0  ;;  %p1169_p10 = por %p1168_p7, %p1167_p5 }
  0x2c   : > { %p1170_p9 = pnand %p1169_p10, %p1163_p3 }
  0x2e   : > { %1173 = shalt.err (!%p1170_p9)
}
  0x2f   : > { %s1373_s8 = smov [#allocation10]   ;;  %s1174_s9 = scalar_lea.vmem %s250_s20, 128 }
  0x30   : > { %1071 = dma.vmem_to_smem (!%p1496_p11), %s261_s16, 128, %s1373_s8, [#allocation11]  }
  0x31   : > { %p1175_p6 = scmp.ne.s32.totalorder %s250_s20, %s1174_s9  ;;  %p1182_p8 = scmp.lt.s32.totalorder %s250_s20, %s250_s20 }
  0x32   : > { %p1183_p2 = scmp.lt.s32.totalorder %s1174_s9, %s1174_s9 }
  0x33   : > { %p1177_p1 = pnand %p1175_p6, %p1161_p13 }
  0x34   : > { %p1184_p12 = por %p1183_p2, %p1182_p8 }
  0x35   : > { %p1178_p4 = pneg %p1177_p1 }
  0x37   : > { %p1185_p0 = pnand %p1184_p12, %p1178_p4 }
  0x39   : > { %1188 = shalt.err (!%p1185_p0)
}
  0x3a   : > { %s1374_s14 = smov [#allocation9]   ;;  %s2013_s5 = sld [smem:[#allocation33_spill]] }
  0x3b   : > { %1068 = dma.vmem_to_smem (!%p1496_p11), %s250_s20, 128, %s1374_s14, [#allocation6]  }
  0x3c   : > { %s1189_s19 = scalar_lea.vmem %s1503_s24, 16  ;;  %p1197_p4 = scmp.lt.s32.totalorder %s1503_s24, %s1503_s24 }
  0x3d   : > { %p1190_p6 = scmp.ne.s32.totalorder %s1503_s24, %s1189_s19  ;;  %p1198_p8 = scmp.lt.s32.totalorder %s1189_s19, %s1189_s19 }
  0x3f   : > { %p1192_p1 = pnand %p1190_p6, %p1161_p13  ;;  %p1199_p9 = por %p1198_p8, %p1197_p4 }
  0x40   : > { %s282_s18 = sshll.u32 %s2013_s5, 4  ;;  %s283_s18 = int_to_ptr.vmem [resolvable:$true] %s282_s18 }
  0x41   : > { %p1193_p2 = pneg %p1192_p1 }
  0x43   : > { %p1200_p3 = pnand %p1199_p9, %p1193_p2 }
  0x45   : > { %1203 = shalt.err (!%p1200_p3)
}
  0x46   : > { %s1375_s22 = smov [#allocation12]   ;;  %s1204_s20 = scalar_lea.vmem %s283_s18, 16 }
  0x47   : > { %1074 = dma.vmem_to_smem (!%p1496_p11), %s1503_s24, 16, %s1375_s22, [#allocation11]  }
  0x48   : > { %p1205_p5 = scmp.ne.s32.totalorder %s283_s18, %s1204_s20  ;;  %p1212_p12 = scmp.lt.s32.totalorder %s283_s18, %s283_s18 }
  0x49   : > { %p1213_p0 = scmp.lt.s32.totalorder %s1204_s20, %s1204_s20 }
  0x4a   : > { %p1207_p7 = pnand %p1205_p5, %p1161_p13 }
  0x4b   : > { %p1214_p6 = por %p1213_p0, %p1212_p12 }
  0x4c   : > { %p1208_p10 = pneg %p1207_p7 }
  0x4e   : > { %p1215_p1 = pnand %p1214_p6, %p1208_p10 }
  0x50   : > { %1218 = shalt.err (!%p1215_p1)
}
  0x51   : > { %s1376_s23 = smov [#allocation13]   ;;  %s42_s24 = sadd.s32 1, %s1367_s30 }
  0x52   : > { %1077 = dma.vmem_to_smem (!%p1496_p11), %s283_s18, 16, %s1376_s23, [#allocation14]  }
  0x53   : > { %s51_s25 = sadd.s32 1, %s1359_s28  ;;  %p44_p13 = scmp.ge.s32.totalorder %s42_s24, 2 }
  0x54   : > { %p58_p2 = scmp.ne.s32.totalorder %s1359_s28, %s1355_s27  ;;  %p59_p4 = scmp.eq.s32.totalorder %s1371_s6, 0 }
  0x55   : > { %p1093_p8 = scmp.lt.s32.totalorder %s1371_s6, 2  ;;  %s2035_s24 = smov (%p44_p13, %s42_s24), 0 }
  0x56   : > { %2014 = sst [smem:[#allocation26_spill]] %s2035_s24  ;;  %p60_p9 = por %p59_p4, %p58_p2 }
  0x57   : > { %p2015_p3 = scmp.ne.s32.totalorder %s2005_s11, 0  ;;  %s46_s8 = ssub.s32 %s1367_s30, %s2035_s24 }
  0x58   : > { %s1552_s9 = sand.u32 1, %s1359_s28   ;;  %p49_p11 = scmp.eq.s32.totalorder %s46_s8, 0 }
  0x59   : > { %p1545_p5 = por %p2015_p3, %p58_p2  ;;  %s1986_s14 = sshll.u32 %s1552_s9, 5 }
  0x5a   : > { %s1987_s15 = sshll.u32 %s1367_s30, 9  ;;  %s2018_s0 = sld [smem:[#allocation28_spill]] }
  0x5b   : > { %s1557_s16 = scalar_select %p49_p11, %s1359_s28, %s51_s25  }
  0x5c   : > { %s300_s22 = scalar_lea.vmem [#allocation3], %s1986_s14  ;;  %p1568_p7 = pnand %p1093_p8, %p60_p9 }
  0x5d   : > { %2017 = sst [smem:[#allocation27_spill]] %s1557_s16  ;;  %s308_s20 = sshll.u32 %s300_s22, 4  ;;  %s309_s20 = int_to_ptr.vmem [resolvable:$true] %s308_s20 }
  0x5e   : > { %s297_s8 = scalar_lea.sflag [#allocation4], %s1552_s9  ;;  %p1221_p10 = pneg %p1568_p7 }
  0x5f   : > { %s1232_s25 = scalar_lea.vmem %s309_s20, 512  ;;  %s1377_s18 = smov [#allocation3]  }
  0x60   : > { %s307_s11 = scalar_lea.hbm %s2018_s0, %s1987_s15  ;;  %p1233_p12 = scmp.ne.s32.totalorder %s309_s20, %s1232_s25 }
  0x61   : > { %s1237_s19 = sshll.u32 %s1377_s18, 4  ;;  %s1238_s19 = int_to_ptr.vmem [resolvable:$false] %s1237_s19 }
  0x62   : > { %p1235_p0 = pnand %p1233_p12, %p1221_p10  ;;  %s1239_s22 = scalar_lea.vmem %s1238_s19, 1024 }
  0x63   : > { %p1240_p1 = scmp.lt.s32.totalorder %s309_s20, %s1238_s19  ;;  %p1241_p13 = scmp.lt.s32.totalorder %s1239_s22, %s1232_s25 }
  0x64   : > { %p1236_p6 = pneg %p1235_p0 }
  0x65   : > { %p1242_p2 = por %p1241_p13, %p1240_p1 }
  0x67   : > { %p1243_p4 = pnand %p1242_p2, %p1236_p6 }
  0x69   : > { %1246 = shalt.err (!%p1243_p4)
}
  0x6a   : > { %s1378_s14 = smov 128   ;;  %s1379_s15 = smov 8  }
  0x6b   : > { %1081 = dma.hbm_to_vmem [thread:$0]  (!%p1568_p7), %s307_s11, 512, %s309_s20, %s297_s8, %s1378_s14, %s1378_s14, %s1379_s15  }
  0x6c   : > { %s2020_s0 = sshll.u32 %s1367_s30, 9  ;;  %s2021_s1 = sld [smem:[#allocation29_spill]] }
  0x6d   : > { %s2022_s4 = sshll.u32 %s1552_s9, 5  ;;  %s319_s22 = scalar_lea.sflag [#allocation8], %s1552_s9 }
  0x6e   : > { %s322_s19 = scalar_lea.vmem [#allocation7], %s2022_s4  ;;  %s1380_s24 = smov [#allocation7]  }
  0x6f   : > { %s330_s25 = sshll.u32 %s322_s19, 4  ;;  %s1265_s16 = sshll.u32 %s1380_s24, 4  ;;  %s331_s25 = int_to_ptr.vmem [resolvable:$true] %s330_s25  ;;  %s1266_s16 = int_to_ptr.vmem [resolvable:$false] %s1265_s16 }
  0x70   : > { %s1260_s5 = scalar_lea.vmem %s331_s25, 512  ;;  %s1267_s11 = scalar_lea.vmem %s1266_s16, 1024 }
  0x71   : > { %p1261_p8 = scmp.ne.s32.totalorder %s331_s25, %s1260_s5  ;;  %p1268_p11 = scmp.lt.s32.totalorder %s331_s25, %s1266_s16 }
  0x72   : > { %s329_s18 = scalar_lea.hbm %s2021_s1, %s2020_s0  ;;  %p1269_p12 = scmp.lt.s32.totalorder %s1267_s11, %s1260_s5 }
  0x73   : > { %p1263_p9 = pnand %p1261_p8, %p1221_p10 }
  0x74   : > { %p1270_p0 = por %p1269_p12, %p1268_p11 }
  0x75   : > { %p1264_p3 = pneg %p1263_p9 }
  0x77   : > { %p1271_p6 = pnand %p1270_p0, %p1264_p3 }
  0x79   : > { %1274 = shalt.err (!%p1271_p6)
}
  0x7a   : > { %1084 = dma.hbm_to_vmem [thread:$0]  (!%p1568_p7), %s329_s18, 512, %s331_s25, %s319_s22, %s1378_s14, %s1378_s14, %s1379_s15  }
  0x7b   : > { %p2023_p1 = scmp.ne.s32.totalorder %s2009_s17, 0 }
  0x7c   : > { %s1596_s0 = sand.u32 (!%p2023_p1), 1, %s1355_s27   ;;  %p2024_p10 = scmp.ne.s32.totalorder (!%p2023_p1), %s2006_s12, 0 }
  0x7d   : > { %342 = sbr.rel (%p2023_p1) target bundleno = 293 (0x125), region = 48  ;;  %s1599_s2 = sshll.u32 (!%p2023_p1), %s1596_s0, 5 }
  0x7e   : > { %s345_s3 = scalar_lea.sflag (!%p2023_p1), [#allocation4], %s1596_s0  ;;  %s1603_s4 = scalar_lea.vmem (!%p2023_p1), [#allocation3], %s1599_s2 }
  0x82   : > { %1326 = dma.done.wait (%p2024_p10), %s345_s3, 512  }
  0x83   : > { %1328 = vsyncadd (%p2024_p10), %s345_s3, 4294966784  ;;  %s354_s5 = scalar_lea.sflag [#allocation8], %s1596_s0  ;;  %s1611_s17 = scalar_lea.vmem [#allocation7], %s1599_s2 }
  0x84   : > { %1330 = dma.done.wait (%p2024_p10), %s354_s5, 512  }
  0x85   : > { %1332 = vsyncadd (%p2024_p10), %s354_s5, 4294966784  ;;  %p2025_p7 = scmp.ne.s32.totalorder %s2004_s10, 0 }
  0x87   : > { %1334 = dma.done.wait (%p2025_p7), [#allocation6], 128  }
  0x88   : > { %1336 = vsyncadd (%p2025_p7), [#allocation6], 4294967168 }
  0x89   : > { %1338 = dma.done.wait (%p2025_p7), [#allocation11], 144  }
  0x8a   : > { %1340 = vsyncadd (%p2025_p7), [#allocation11], 4294967152 }
  0x8b   : > { %1342 = dma.done.wait (%p2025_p7), [#allocation14], 16  }
  0x8c   : > { %1344 = vsyncadd (%p2025_p7), [#allocation14], 4294967280 }
  0x8d   : > { %378 = sfence }
  0x8e   : > { %s1629_s12 = sld [smem:[#allocation2]]  ;;  %v1644_v0 = vld [vmem:[%s1603_s4] sm:$0xff]  ;;  %v1654_v4 = vld [vmem:[%s1603_s4 + $0x8] sm:$0xff]  ;;  %v1666_v8 = vld [vmem:[%s1603_s4 + $0x10] sm:$0xff] }
  0x8f   : > { %s412_s24 = sld [smem:[#allocation12]]  ;;  %v1676_v13 = vld [vmem:[%s1603_s4 + $0x18] sm:$0xff]  ;;  %v1692_v20 = vld [vmem:[%s1611_s17] sm:$0xff]  ;;  %v1710_v31 = vld [vmem:[%s1611_s17 + $0x8] sm:$0xff] }
  0x90   : > { %s414_s9 = sld [smem:[#allocation9]]  ;;  %v1723_v41 = vld [vmem:[%s1611_s17 + $0x10] sm:$0xff]  ;;  %v1745_v55 = vld [vmem:[%s1611_s17 + $0x18] sm:$0xff] }
  0x91   : > { %s946_s14 = sld [smem:[#allocation9 + $0x1]] }
  0x92   : > { %s948_s15 = sld [smem:[#allocation9 + $0x2]] }
  0x93   : > { %s1631_s16 = sld [smem:[#allocation9 + $0x3]] }
  0x94   : > { %s1633_s20 = sld [smem:[#allocation10]] }
  0x95   : > { %s1635_s23 = sld [smem:[#allocation10 + $0x1]]  ;;  %v413_v3 = vstv %s412_s24 }
  0x96   : > { %s1637_s8 = sld [smem:[#allocation10 + $0x2]]  ;;  %v416_v1 = vstv %s414_s9 }
  0x97   : > { %s1639_s18 = sld [smem:[#allocation10 + $0x3]]  ;;  %v417_v2 = vmul.f32 %v416_v1, %v1644_v0  ;;  %v422_v5 = vstv %s946_s14 }
  0x98   : > { %s1641_s10 = sld [smem:[#allocation13]]  ;;  %v423_v7 = vmul.f32 %v1654_v4, %v422_v5  ;;  %v428_v9 = vstv %s948_s15 }
  0x99   : > { %s1646_s19 = sld [smem:[#allocation12 + $0x1]]  ;;  %v418_v6 = vadd.f32 %v417_v2, %v413_v3  ;;  %v429_v12 = vmul.f32 %v1666_v8, %v428_v9  ;;  %v434_v14 = vstv %s1631_s16 }
  0x9a   : > { %s959_s25 = sld [smem:[#allocation9 + $0x80]]  ;;  %v435_v19 = vmul.f32 %v1676_v13, %v434_v14  ;;  %v439_v21 = vstv %s1633_s20 }
  0x9b   : > { %s1648_s22 = sld [smem:[#allocation9 + $0x81]]  ;;  %v424_v11 = vadd.f32 %v423_v7, %v418_v6  ;;  %v440_v30 = vmul.f32 %v439_v21, %v1692_v20  ;;  %v445_v32 = vstv %s1635_s23 }
  0x9c   : > { %s1651_s11 = sld [smem:[#allocation9 + $0x82]]  ;;  %v446_v40 = vmul.f32 %v1710_v31, %v445_v32  ;;  %v451_v42 = vstv %s1637_s8 }
  0x9d   : > { %s1656_s3 = sld [smem:[#allocation9 + $0x83]]  ;;  %v430_v18 = vadd.f32 %v429_v12, %v424_v11  ;;  %v452_v48 = vmul.f32 %v1723_v41, %v451_v42  ;;  %v457_v56 = vstv %s1639_s18 }
  0x9e   : > { %s1658_s5 = sld [smem:[#allocation10 + $0x80]]  ;;  %v458_v3 = vmul.f32 %v1745_v55, %v457_v56 }
  0x9f   : > { %s1660_s9 = sld [smem:[#allocation10 + $0x81]]  ;;  %v466_v16 = vstv %s1646_s19  ;;  %v436_v29 = vadd.f32 %v435_v19, %v430_v18 }
  0xa0   : > { %s1663_s1 = sld [smem:[#allocation10 + $0x82]]  ;;  %v468_v10 = vstv %s959_s25 }
  0xa1   : > { %s1668_s24 = sld [smem:[#allocation10 + $0x83]]  ;;  %v469_v15 = vmul.f32 %v468_v10, %v1644_v0  ;;  %v472_v17 = vstv %s1648_s22  ;;  %v441_v39 = vadd.f32 %v440_v30, %v436_v29 }
  0xa2   : > { %s1670_s14 = sld [smem:[#allocation12 + $0x2]]  ;;  %v473_v23 = vmul.f32 %v1654_v4, %v472_v17  ;;  %v476_v25 = vstv %s1651_s11 }
  0xa3   : > { %s969_s30 = sld [smem:[#allocation9 + $0x100]]  ;;  %v470_v22 = vadd.f32 %v469_v15, %v466_v16  ;;  %v477_v34 = vmul.f32 %v1666_v8, %v476_v25  ;;  %v480_v35 = vstv %s1656_s3  ;;  %v447_v51 = vadd.f32 %v446_v40, %v441_v39 }
  0xa4   : > { %s1673_s28 = sld [smem:[#allocation9 + $0x101]]  ;;  %v481_v44 = vmul.f32 %v1676_v13, %v480_v35  ;;  %v484_v45 = vstv %s1658_s5 }
  0xa5   : > { %s1680_s15 = sld [smem:[#allocation13 + $0x1]]  ;;  %v474_v33 = vadd.f32 %v473_v23, %v470_v22  ;;  %v485_v58 = vmul.f32 %v484_v45, %v1692_v20  ;;  %v488_v59 = vstv %s1660_s9  ;;  %v453_v2 = vadd.f32 %v452_v48, %v447_v51 }
  0xa6   : > { %s1684_s25 = sld [smem:[#allocation9 + $0x102]]  ;;  %v489_v7 = vmul.f32 %v1710_v31, %v488_v59  ;;  %v492_v9 = vstv %s1663_s1  ;;  %v462_v45 = vstv %s1641_s10 }
  0xa7   : > { %s1686_s27 = sld [smem:[#allocation9 + $0x103]]  ;;  %v478_v43 = vadd.f32 %v477_v34, %v474_v33  ;;  %v459_v16 = vadd.f32 %v458_v3, %v453_v2  ;;  %v493_v17 = vmul.f32 %v1723_v41, %v492_v9  ;;  %v496_v18 = vstv %s1668_s24 }
  0xa8   : > { %s1689_s6 = sld [smem:[#allocation10 + $0x100]]  ;;  %v505_v27 = vstv %s1670_s14 }
  0xa9   : > { %v507_v24 = vstv %s969_s30  ;;  %s1696_s4 = sld [smem:[#allocation10 + $0x101]]  ;;  %v482_v57 = vadd.f32 %v481_v44, %v478_v43  ;;  %v461_v40 = vmax.f32 %v459_v16, 0.0 }
  0xaa   : > { %v508_v26 = vmul.f32 %v507_v24, %v1644_v0  ;;  %s1700_s16 = sld [smem:[#allocation10 + $0x102]]  ;;  %v511_v28 = vstv %s1673_s28 }
  0xab   : > { %s1704_s19 = sld [smem:[#allocation10 + $0x103]]  ;;  %v512_v37 = vmul.f32 %v1654_v4, %v511_v28  ;;  %v486_v6 = vadd.f32 %v485_v58, %v482_v57  ;;  %v463_v57 = vmul.f32 %v462_v45, %v461_v40 }
  0xac   : > { %s1707_s20 = sld [smem:[#allocation12 + $0x3]]  ;;  %v509_v36 = vadd.f32 %v508_v26, %v505_v27  ;;  %v515_v38 = vstv %s1684_s25 }
  0xad   : > { %s979_s30 = sld [smem:[#allocation9 + $0x180]]  ;;  %v516_v47 = vmul.f32 %v1666_v8, %v515_v38  ;;  %v519_v49 = vstv %s1686_s27  ;;  %v490_v21 = vadd.f32 %v489_v7, %v486_v6  ;;  %v497_v38 = vmul.f32 %v1745_v55, %v496_v18 }
  0xae   : > { %s1716_s28 = sld [smem:[#allocation9 + $0x181]]  ;;  %v513_v46 = vadd.f32 %v512_v37, %v509_v36  ;;  %v520_v61 = vmul.f32 %v1676_v13, %v519_v49  ;;  %v523_v62 = vstv %s1689_s6 }
  0xaf   : > { %s1719_s22 = sld [smem:[#allocation13 + $0x2]]  ;;  %v524_v11 = vmul.f32 %v523_v62, %v1692_v20  ;;  %v527_v12 = vstv %s1696_s4  ;;  %v494_v37 = vadd.f32 %v493_v17, %v490_v21 }
  0xb0   : > { %s1726_s23 = sld [smem:[#allocation9 + $0x182]]  ;;  %v517_v60 = vadd.f32 %v516_v47, %v513_v46  ;;  %v531_v22 = vstv %s1700_s16  ;;  %v528_v26 = vmul.f32 %v1710_v31, %v527_v12 }
  0xb1   : > { %s1729_s11 = sld [smem:[#allocation9 + $0x183]]  ;;  %v532_v43 = vmul.f32 %v1723_v41, %v531_v22  ;;  %v535_v46 = vstv %s1704_s19 }
  0xb2   : > { %s1733_s3 = sld [smem:[#allocation10 + $0x180]]  ;;  %v544_v52 = vstv %s1707_s20  ;;  %v521_v10 = vadd.f32 %v520_v61, %v517_v60  ;;  %v536_v59 = vmul.f32 %v1745_v55, %v535_v46 }
  0xb3   : > { %v546_v50 = vstv %s979_s30  ;;  %s1737_s8 = sld [smem:[#allocation10 + $0x181]] }
  0xb4   : > { %v547_v53 = vmul.f32 %v546_v50, %v1644_v0  ;;  %v550_v54 = vstv %s1716_s28  ;;  %s1742_s14 = sld [smem:[#allocation10 + $0x182]]  ;;  %v525_v25 = vadd.f32 %v524_v11, %v521_v10 }
  0xb5   : > { %s1749_s27 = sld [smem:[#allocation10 + $0x183]]  ;;  %v551_v1 = vmul.f32 %v1654_v4, %v550_v54  ;;  %v501_v54 = vstv %s1680_s15 }
  0xb6   : > { %s1753_s5 = sld [smem:[#allocation12 + $0x4]]  ;;  %v548_v63 = vadd.f32 %v547_v53, %v544_v52  ;;  %v554_v5 = vstv %s1726_s23  ;;  %v529_v42 = vadd.f32 %v528_v26, %v525_v25  ;;  %v411_v52 = vstv %s1629_s12 }
  0xb7   : > { %s989_s17 = sld [smem:[#allocation9 + $0x200]]  ;;  %v555_v15 = vmul.f32 %v1666_v8, %v554_v5  ;;  %v558_v19 = vstv %s1729_s11  ;;  %v498_v53 = vadd.f32 %v497_v38, %v494_v37 }
  0xb8   : > { %s990_s18 = sld [smem:[#allocation9 + $0x201]]  ;;  %v552_v14 = vadd.f32 %v551_v1, %v548_v63  ;;  %v559_v30 = vmul.f32 %v1676_v13, %v558_v19  ;;  %v562_v34 = vstv %s1733_s3  ;;  %v533_v58 = vadd.f32 %v532_v43, %v529_v42 }
  0xb9   : > { %s991_s9 = sld [smem:[#allocation9 + $0x202]]  ;;  %v563_v48 = vmul.f32 %v562_v34, %v1692_v20  ;;  %v566_v49 = vstv %s1737_s8  ;;  %v500_v7 = vmax.f32 %v498_v53, 0.0 }
  0xba   : > { %s1762_s6 = sld [smem:[#allocation9 + $0x203]]  ;;  %v556_v29 = vadd.f32 %v555_v15, %v552_v14  ;;  %v570_v60 = vstv %s1742_s14  ;;  %v567_v62 = vmul.f32 %v1710_v31, %v566_v49  ;;  %v537_v12 = vadd.f32 %v536_v59, %v533_v58 }
  0xbb   : > { %s1766_s25 = sld [smem:[#allocation13 + $0x3]]  ;;  %v571_v14 = vmul.f32 %v1723_v41, %v570_v60  ;;  %v574_v18 = vstv %s1749_s27 }
  0xbc   : > { %s1771_s20 = sld [smem:[#allocation10 + $0x200]]  ;;  %v583_v23 = vstv %s1753_s5  ;;  %v560_v47 = vadd.f32 %v559_v30, %v556_v29 }
  0xbd   : > { %v585_v24 = vstv %s989_s17  ;;  %s1775_s1 = sld [smem:[#allocation10 + $0x201]] }
  0xbe   : > { %v586_v27 = vmul.f32 %v585_v24, %v1644_v0  ;;  %v589_v28 = vstv %s990_s18  ;;  %s1779_s4 = sld [smem:[#allocation10 + $0x202]]  ;;  %v564_v61 = vadd.f32 %v563_v48, %v560_v47 }
  0xbf   : > { %v590_v32 = vmul.f32 %v1654_v4, %v589_v28  ;;  %v593_v33 = vstv %s991_s9  ;;  %s1783_s24 = sld [smem:[#allocation10 + $0x203]] }
  0xc0   : > { %v587_v35 = vadd.f32 %v586_v27, %v583_v23  ;;  %v594_v36 = vmul.f32 %v1666_v8, %v593_v33  ;;  %s1787_s16 = sld [smem:[#allocation12 + $0x5]]  ;;  %v597_v39 = vstv %s1762_s6  ;;  %v568_v17 = vadd.f32 %v567_v62, %v564_v61 }
  0xc1   : > { %s1791_s30 = sld [smem:[#allocation9 + $0x280]]  ;;  %v598_v51 = vmul.f32 %v1676_v13, %v597_v39  ;;  %v464_v27 = vadd.f32 %v463_v57, %v411_v52  ;;  %v540_v33 = vstv %s1719_s22 }
  0xc2   : > { %v591_v44 = vadd.f32 %v590_v32, %v587_v35  ;;  %s1794_s28 = sld [smem:[#allocation9 + $0x281]]  ;;  %v601_v56 = vstv %s1771_s20  ;;  %v502_v32 = vmul.f32 %v501_v54, %v500_v7  ;;  %v572_v34 = vadd.f32 %v571_v14, %v568_v17 }
  0xc3   : > { %s1799_s23 = sld [smem:[#allocation9 + $0x282]]  ;;  %v602_v3 = vmul.f32 %v601_v56, %v1692_v20  ;;  %v605_v9 = vstv %s1775_s1  ;;  %v575_v35 = vmul.f32 %v1745_v55, %v574_v18 }
  0xc4   : > { %v595_v50 = vadd.f32 %v594_v36, %v591_v44  ;;  %s1803_s11 = sld [smem:[#allocation9 + $0x283]]  ;;  %v606_v23 = vmul.f32 %v1710_v31, %v605_v9  ;;  %v609_v26 = vstv %s1779_s4  ;;  %v539_v36 = vmax.f32 %v537_v12, 0.0 }
  0xc5   : > { %s1808_s10 = sld [smem:[#allocation10 + $0x280]]  ;;  %v610_v38 = vmul.f32 %v1723_v41, %v609_v26  ;;  %v613_v40 = vstv %s1783_s24  ;;  %v503_v49 = vadd.f32 %v502_v32, %v464_v27 }
  0xc6   : > { %s1812_s19 = sld [smem:[#allocation10 + $0x281]]  ;;  %v622_v63 = vstv %s1787_s16  ;;  %v599_v2 = vadd.f32 %v598_v51, %v595_v50  ;;  %v576_v50 = vadd.f32 %v575_v35, %v572_v34  ;;  %v614_v54 = vmul.f32 %v1745_v55, %v613_v40 }
  0xc7   : > { %s1815_s3 = sld [smem:[#allocation13 + $0x4]]  ;;  %v624_v1 = vstv %s1791_s30  ;;  %v541_v62 = vmul.f32 %v540_v33, %v539_v36 }
  0xc8   : > { %v625_v5 = vmul.f32 %v624_v1, %v1644_v0  ;;  %v628_v6 = vstv %s1794_s28  ;;  %s1822_s12 = sld [smem:[#allocation10 + $0x282]]  ;;  %v603_v22 = vadd.f32 %v602_v3, %v599_v2  ;;  %v578_v3 = vmax.f32 %v576_v50, 0.0 }
  0xc9   : > { %v629_v10 = vmul.f32 %v1654_v4, %v628_v6  ;;  %v632_v11 = vstv %s1799_s23  ;;  %s1827_s15 = sld [smem:[#allocation10 + $0x283]]  ;;  %v579_v6 = vstv %s1766_s25 }
  0xca   : > { %v626_v15 = vadd.f32 %v625_v5, %v622_v63  ;;  %v633_v16 = vmul.f32 %v1666_v8, %v632_v11  ;;  %s1831_s8 = sld [smem:[#allocation12 + $0x6]]  ;;  %v636_v19 = vstv %s1803_s11  ;;  %v607_v37 = vadd.f32 %v606_v23, %v603_v22 }
  0xcb   : > { %v640_v21 = vstv %s1808_s10  ;;  %s1836_s14 = sld [smem:[#allocation9 + $0x300]]  ;;  %v637_v25 = vmul.f32 %v1676_v13, %v636_v19  ;;  %v580_v19 = vmul.f32 %v579_v6, %v578_v3 }
  0xcc   : > { %v630_v24 = vadd.f32 %v629_v10, %v626_v15  ;;  %s1010_s5 = sld [smem:[#allocation9 + $0x301]]  ;;  %v641_v29 = vmul.f32 %v640_v21, %v1692_v20  ;;  %v644_v30 = vstv %s1812_s19  ;;  %v611_v53 = vadd.f32 %v610_v38, %v607_v37 }
  0xcd   : > { %s1841_s17 = sld [smem:[#allocation9 + $0x302]]  ;;  %v645_v42 = vmul.f32 %v1710_v31, %v644_v30  ;;  %v542_v15 = vadd.f32 %v541_v62, %v503_v49 }
  0xce   : > { %v634_v28 = vadd.f32 %v633_v16, %v630_v24  ;;  %s1845_s27 = sld [smem:[#allocation9 + $0x303]]  ;;  %v648_v46 = vstv %s1822_s12  ;;  %v615_v10 = vadd.f32 %v614_v54, %v611_v53  ;;  %v618_v16 = vstv %s1815_s3  ;;  %s1042_s3 = sshll.u32 %s1363_s29, 9 }
  0xcf   : > { %s1849_s18 = sld [smem:[#allocation10 + $0x300]]  ;;  %v649_v59 = vmul.f32 %v1723_v41, %v648_v46  ;;  %v652_v63 = vstv %s1827_s15  ;;  %s409_s12 = scalar_lea.vmem [#allocation15], %s1599_s2 }
  0xd0   : > { %v638_v39 = vadd.f32 %v637_v25, %v634_v28  ;;  %s1852_s9 = sld [smem:[#allocation10 + $0x301]]  ;;  %v661_v43 = vstv %s1831_s8  ;;  %v653_v12 = vmul.f32 %v1745_v55, %v652_v63  ;;  %v617_v28 = vmax.f32 %v615_v10, 0.0  ;;  %s773_s15 = sshll.u32 %s409_s12, 4  ;;  %s1922_s15 = int_to_ptr.vmem [resolvable:$true] %s773_s15 }
  0xd1   : > { %v663_v44 = vstv %s1836_s14  ;;  %s1858_s6 = sld [smem:[#allocation10 + $0x302]]  ;;  %s759_s29 = scalar_lea.sflag [#allocation5], %s1596_s0 }
  0xd2   : > { %v642_v45 = vadd.f32 %v641_v29, %v638_v39  ;;  %s1861_s22 = sld [smem:[#allocation13 + $0x5]]  ;;  %v664_v47 = vmul.f32 %v663_v44, %v1644_v0  ;;  %v667_v48 = vstv %s1010_s5  ;;  %s1920_s5 = scalar_lea.hbm %s1981_s7, %s1042_s3 }
  0xd3   : > { %v668_v51 = vmul.f32 %v1654_v4, %v667_v48  ;;  %v671_v52 = vstv %s1841_s17  ;;  %s1866_s20 = sld [smem:[#allocation10 + $0x303]]  ;;  %s1275_s2 = scalar_lea.vmem %s1922_s15, 512 }
  0xd4   : > { %v665_v56 = vadd.f32 %v664_v47, %v661_v43  ;;  %v672_v57 = vmul.f32 %v1666_v8, %v671_v52  ;;  %s1870_s1 = sld [smem:[#allocation12 + $0x7]]  ;;  %v646_v58 = vadd.f32 %v645_v42, %v642_v45  ;;  %v675_v60 = vstv %s1845_s27  ;;  %p1276_p13 = scmp.ne.s32.totalorder %s1922_s15, %s1275_s2 }
  0xd5   : > { %v679_v61 = vstv %s1849_s18  ;;  %s1019_s4 = sld [smem:[#allocation9 + $0x380]]  ;;  %v676_v2 = vmul.f32 %v1676_v13, %v675_v60  ;;  %v619_v42 = vmul.f32 %v618_v16, %v617_v28  ;;  %s1381_s17 = smov [#allocation15]  }
  0xd6   : > { %v669_v1 = vadd.f32 %v668_v51, %v665_v56  ;;  %s1020_s24 = sld [smem:[#allocation9 + $0x381]]  ;;  %v683_v5 = vstv %s1852_s9  ;;  %v680_v9 = vmul.f32 %v679_v61, %v1692_v20  ;;  %v650_v11 = vadd.f32 %v649_v59, %v646_v58  ;;  %p1277_p2 = pnand %p1276_p13, %p1545_p5 }
  0xd7   : > { %s1878_s16 = sld [smem:[#allocation9 + $0x382]]  ;;  %v687_v14 = vstv %s1858_s6  ;;  %v684_v18 = vmul.f32 %v1710_v31, %v683_v5  ;;  %s1279_s27 = sshll.u32 %s1381_s17, 4  ;;  %s1280_s27 = int_to_ptr.vmem [resolvable:$false] %s1279_s27 }
  0xd8   : > { %v673_v7 = vadd.f32 %v672_v57, %v669_v1  ;;  %s1882_s30 = sld [smem:[#allocation9 + $0x383]]  ;;  %v688_v25 = vmul.f32 %v1723_v41, %v687_v14  ;;  %v654_v29 = vadd.f32 %v653_v12, %v650_v11  ;;  %v657_v48 = vstv %s1861_s22  ;;  %p1278_p4 = pneg %p1277_p2 }
  0xd9   : > { %s1886_s28 = sld [smem:[#allocation10 + $0x380]]  ;;  %v691_v21 = vstv %s1866_s20  ;;  %s1281_s18 = scalar_lea.vmem %s1280_s27, 1024 }
  0xda   : > { %v677_v17 = vadd.f32 %v676_v2, %v673_v7  ;;  %s1890_s25 = sld [smem:[#allocation10 + $0x381]]  ;;  %v700_v22 = vstv %s1870_s1  ;;  %v692_v34 = vmul.f32 %v1745_v55, %v691_v21  ;;  %v656_v44 = vmax.f32 %v654_v29, 0.0  ;;  %p1282_p8 = scmp.lt.s32.totalorder %s1922_s15, %s1280_s27 }
  0xdb   : > { %v702_v23 = vstv %s1019_s4  ;;  %s1894_s23 = sld [smem:[#allocation10 + $0x382]]  ;;  %p1283_p9 = scmp.lt.s32.totalorder %s1281_s18, %s1275_s2 }
  0xdc   : > { %v681_v24 = vadd.f32 %v680_v9, %v677_v17  ;;  %v703_v26 = vmul.f32 %v702_v23, %v1644_v0  ;;  %v706_v27 = vstv %s1020_s24  ;;  %s1900_s11 = sld [smem:[#allocation10 + $0x383]]  ;;  %v658_v53 = vmul.f32 %v657_v48, %v656_v44 }
  0xdd   : > { %v707_v30 = vmul.f32 %v1654_v4, %v706_v27  ;;  %v710_v32 = vstv %s1878_s16  ;;  %s1017_s10 = sld [smem:[#allocation13 + $0x6]]  ;;  %v581_v4 = vadd.f32 %v580_v19, %v542_v15  ;;  %p1284_p3 = por %p1283_p9, %p1282_p8 }
  0xde   : > { %v685_v33 = vadd.f32 %v684_v18, %v681_v24  ;;  %v704_v35 = vadd.f32 %v703_v26, %v700_v22  ;;  %v711_v36 = vmul.f32 %v1666_v8, %v710_v32  ;;  %v714_v37 = vstv %s1882_s30  ;;  %s1027_s19 = sld [smem:[#allocation13 + $0x7]] }
  0xdf   : > { %v718_v0 = vstv %s1886_s28  ;;  %v715_v40 = vmul.f32 %v1676_v13, %v714_v37  ;;  %v620_v51 = vadd.f32 %v619_v42, %v581_v4  ;;  %p1285_p11 = pnand %p1284_p3, %p1278_p4 }
  0xe0   : > { %v689_v38 = vadd.f32 %v688_v25, %v685_v33  ;;  %v708_v39 = vadd.f32 %v707_v30, %v704_v35  ;;  %v722_v43 = vstv %s1890_s25  ;;  %v719_v47 = vmul.f32 %v718_v0, %v1692_v20 }
  0xe1   : > { %v726_v49 = vstv %s1894_s23  ;;  %v723_v8 = vmul.f32 %v1710_v31, %v722_v43  ;;  %v659_v60 = vadd.f32 %v658_v53, %v620_v51 }
  0xe2   : > { %v693_v45 = vadd.f32 %v692_v34, %v689_v38  ;;  %v712_v46 = vadd.f32 %v711_v36, %v708_v39  ;;  %v730_v52 = vstv %s1900_s11  ;;  %v727_v13 = vmul.f32 %v1723_v41, %v726_v49 }
  0xe3   : > { %v696_v57 = vstv %s1017_s10  ;;  %v731_v59 = vmul.f32 %v1745_v55, %v730_v52 }
  0xe4   : > { %v716_v50 = vadd.f32 %v715_v40, %v712_v46  ;;  %v695_v54 = vmax.f32 %v693_v45, 0.0  ;;  %v735_v1 = vstv %s1027_s19 }
  0xe6   : > { %v720_v56 = vadd.f32 %v719_v47, %v716_v50  ;;  %v697_v61 = vmul.f32 %v696_v57, %v695_v54 }
  0xe8   : > { %v724_v58 = vadd.f32 %v723_v8, %v720_v56  ;;  %v698_v2 = vadd.f32 %v697_v61, %v659_v60 }
  0xea   : > { %v728_v62 = vadd.f32 %v727_v13, %v724_v58 }
  0xec   : > { %v732_v63 = vadd.f32 %v731_v59, %v728_v62 }
  0xee   : > { %v734_v3 = vmax.f32 %v732_v63, 0.0 }
  0xf0   : > { %v736_v5 = vmul.f32 %v735_v1, %v734_v3 }
  0xf2   : > { %v737_v6 = vadd.f32 %v736_v5, %v698_v2 }
  0xf4   : > { %v1028_v7 = vmul.f32 -1.442695, %v737_v6 }
  0xf6   : > { %1155 = vpow2.f32 %v1028_v7 }
 0x103   : > { %v1156_v9 = vpop.eup %1155 }
 0x104   : > { %v741_v10 = vadd.f32 1.0, %v1156_v9 }
 0x106   : > { %1157 = vrcp.f32 %v741_v10 }
 0x113   : > { %v1158_v11 = vpop.eup %1157 }
 0x114   : > { %v744_v12 = vmul.f32 %v1158_v11, %v1692_v20  ;;  %v747_v14 = vmul.f32 %v1158_v11, %v1710_v31  ;;  %v751_v15 = vmul.f32 %v1158_v11, %v1723_v41  ;;  %v755_v16 = vmul.f32 %v1158_v11, %v1745_v55 }
 0x116   : > { %745 = vst [vmem:[%s409_s12] sm:$0xff] %v744_v12  ;;  %1030 = vst [vmem:[%s409_s12 + $0x8] sm:$0xff] %v747_v14 }
 0x117   : > { %1032 = vst [vmem:[%s409_s12 + $0x10] sm:$0xff] %v751_v15  ;;  %1034 = vst [vmem:[%s409_s12 + $0x18] sm:$0xff] %v755_v16 }
 0x118   : > { %1288 = shalt.err (!%p1285_p11)
}
 0x119   : > { %s1289_s9 = scalar_lea.hbm %s1920_s5, 512  ;;  %s1293_s20 = scalar_lea.hbm %s1981_s7, 1024 }
 0x11a   : > { %p1290_p12 = scmp.ne.s32.totalorder %s1920_s5, %s1289_s9  ;;  %p1294_p1 = scmp.lt.s32.totalorder %s1920_s5, %s1981_s7 }
 0x11b   : > { %p1295_p10 = scmp.lt.s32.totalorder %s1293_s20, %s1289_s9 }
 0x11c   : > { %p1291_p0 = pnand %p1290_p12, %p1545_p5 }
 0x11d   : > { %p1296_p7 = por %p1295_p10, %p1294_p1 }
 0x11e   : > { %p1292_p6 = pneg %p1291_p0 }
 0x120   : > { %p1297_p13 = pnand %p1296_p7, %p1292_p6 }
 0x122   : > { %1300 = shalt.err (!%p1297_p13)
}
 0x123   : > { %s1382_s24 = smov 128   ;;  %s1383_s16 = smov 8  }
 0x124   : > { %1063 = dma.vmem_to_hbm [thread:$0]  (%p1545_p5), %s1922_s15, 512, %s1920_s5, %s759_s29, %s1382_s24, %s1382_s24, %s1383_s16  }
 0x125 PF: > { %s2026_s30 = sld [smem:[#allocation25_spill]]  ;;  %s788_s28 = sand.u32 1, %s1351_s26  }
 0x126   : > { %p2027_p2 = scmp.ne.s32.totalorder %s2007_s13, 0  ;;  %s789_s25 = scalar_lea.sflag [#allocation5], %s788_s28 }
 0x12b   : > { %p2028_p4 = scmp.ge.s32.totalorder %s2026_s30, 2 }
 0x12d   : > { %p1086_p8 = pnand %p2028_p4, %p2027_p2 }
 0x12f   : > { %p1087_p9 = pneg %p1086_p8 }
 0x131   : > { %1346 = dma.done.wait (%p1087_p9), %s789_s25, 512  }
 0x132   : > { %1348 = vsyncadd (%p1087_p9), %s789_s25, 4294966784  ;;  %s30_s6 = sadd.s32 1, %s2026_s30   ;;  %s2029_s26 = sld [smem:[#allocation22_spill]] }
 0x133   : > { %p27_p3 = scmp.ge.s32.totalorder %s30_s6, 4   ;;  %s2030_s27 = sld [smem:[#allocation23_spill]] }
 0x134   : > { %s2031_s28 = sld [smem:[#allocation27_spill]] }
 0x135   : > { %s2032_s29 = sld [smem:[#allocation24_spill]]  ;;  %29 = sbr.rel (!%p27_p3) target bundleno = 19 (0x13), region = 132 }
 0x136   : > { %s2033_s30 = sld [smem:[#allocation26_spill]] }
 0x13a   :  { %794 = vsyncpa [#allocation4], 1 }
 0x13b   :  { %796 = vsyncpa [#allocation4 + $0x1], 1 }
 0x13c   :  { %797 = vsyncpa [#allocation8], 1 }
 0x13d   :  { %799 = vsyncpa [#allocation8 + $0x1], 1 }
 0x13e   :  { %800 = vsyncpa [#allocation5], 1 }
 0x13f   :  { %802 = vsyncpa [#allocation5 + $0x1], 1 }
 0x140   :  { %803 = vsyncpa [#allocation6], 1 }
 0x141   :  { %805 = vsyncpa [#allocation6 + $0x1], 1 }
 0x142   :  { %806 = vsyncpa [#allocation11], 1 }
 0x143   :  { %807 = vsyncpa [#allocation14], 1 }

</bundles_post_ra>
